<compile_context>
chip_gen: v6e
topology: v6e:2x2x1
jax: 0.10.0
libtpu: 0.0.40
codegen_flags: <defaults>
</compile_context>

<pallas_src>
import functools

import jax
import jax.numpy as jnp
from jax.experimental import pallas as pl
from jax.experimental.pallas import tpu as pltpu

EPS = 0.8          # nn.BatchNorm2d(in_features, 0.8) -> eps = 0.8
_PAD_TOP = 8       # sublane-aligned top halo (f32 tile = 8 rows); only row 7 is read


def _banded_conv_weights(w_hwio, W):
    """(3, 3, Ci, Co) HWIO -> (3, W*Ci, W*Co) block-banded matrices.

    wb[dy][xq*Ci + ci, x*Co + co] = w[dy, xq - x + 1, ci, co] when
    0 <= xq - x + 1 < 3, else 0.  Band truncation at the xq edges implements the
    zero padding along W, so the kernel scratch only needs a row (H) halo.
    """
    kh, kw, Ci, Co = w_hwio.shape
    d = jnp.arange(W)[:, None] - jnp.arange(W)[None, :] + 1          # (W, W)
    valid = (d >= 0) & (d < kw)
    blocks = w_hwio[:, jnp.clip(d, 0, kw - 1)]                       # (kh, W, W, Ci, Co)
    blocks = blocks * valid[None, :, :, None, None].astype(w_hwio.dtype)
    return blocks.transpose(0, 1, 3, 2, 4).reshape(kh, W * Ci, W * Co)


def prepare_params(params, W):
    """One-time parameter prep, hoisted out of the per-call path (review #5).

    Cache the returned tuple per weight set and reuse it across calls.
    """
    w1, b1, g1, be1, a, w2, b2, g2, be2 = params
    C = w1.shape[2]
    wb1 = _banded_conv_weights(w1.astype(jnp.float32), W).astype(jnp.bfloat16)
    wb2 = _banded_conv_weights(w2.astype(jnp.float32), W).astype(jnp.bfloat16)
    bw1 = jnp.tile(b1.reshape(1, C).astype(jnp.float32), (1, W))     # (1, W*C)
    bw2 = jnp.tile(b2.reshape(1, C).astype(jnp.float32), (1, W))
    sel = jnp.tile(jnp.eye(C, dtype=jnp.float32), (W, 1))            # (W*C, C)
    return (wb1, bw1,
            g1.reshape(1, C).astype(jnp.float32),
            be1.reshape(1, C).astype(jnp.float32),
            a.reshape(1, 1).astype(jnp.float32),
            wb2, bw2,
            g2.reshape(1, C).astype(jnp.float32),
            be2.reshape(1, C).astype(jnp.float32),
            sel)


def _resblock_kernel(x_ref, wb1_ref, bw1_ref, g1_ref, be1_ref, a_ref,
                     wb2_ref, bw2_ref, g2_ref, be2_ref, sel_ref,
                     o_ref, pad_ref, *, N, H, W, C):
    WC = W * C
    M = N * H
    inv_count = 1.0 / float(N * H * W)
    itop, ibot = _PAD_TOP, _PAD_TOP + H
    sel = sel_ref[...]                                    # (WC, C) channel selector

    def interior_load():
        return pad_ref[:, itop:ibot, :].reshape(M, WC)    # f32

    def interior_store(v):
        pad_ref[:, itop:ibot, :] = v.reshape(N, H, WC)

    def conv(wb_ref, bw_ref):
        # 3 matmuls (one per dy row-tap), K = W*C, bf16 LHS slabs and banded
        # bf16 weights with f32 accumulation (review #8).
        acc = bw_ref[...]                                 # (1, WC) bias, broadcasts
        for dy in range(3):
            s = itop - 1 + dy
            slab = pad_ref[:, s:s + H, :].reshape(M, WC).astype(jnp.bfloat16)
            acc = acc + jnp.dot(slab, wb_ref[dy],
                                preferred_element_type=jnp.float32)
        return acc                                        # (M, WC) f32

    def bn_coeffs(g_ref, be_ref):
        # Training-mode BN: biased batch stats over (N, H, W), per channel, all
        # in f32.  sum/sumsq and scale/shift are batched two-at-a-time so we do
        # 2 tiny MXU pushes instead of 4 (review #9).
        v = interior_load()
        rs = jnp.concatenate([jnp.sum(v, axis=0, keepdims=True),
                              jnp.sum(v * v, axis=0, keepdims=True)], axis=0)
        stats = jnp.dot(rs, sel, preferred_element_type=jnp.float32) * inv_count
        mean_c = stats[0:1, :]                            # (1, C)
        var_c = stats[1:2, :] - mean_c * mean_c           # biased variance (f32)
        scale_c = g_ref[...] * jax.lax.rsqrt(var_c + EPS)
        shift_c = be_ref[...] - mean_c * scale_c
        dims = (((1,), (1,)), ((), ()))                   # contract channel axes
        wide = jax.lax.dot_general(jnp.concatenate([scale_c, shift_c], axis=0),
                                   sel, dims, preferred_element_type=jnp.float32)
        return wide[0:1, :], wide[1:2, :]                 # (1, WC) each

    # Zero ONLY the two halo rows the convs read (review #1); the interior is
    # fully overwritten below and rows 0.._PAD_TOP-2 are never touched.
    zrow = jnp.zeros((N, 1, WC), pad_ref.dtype)
    pad_ref[:, itop - 1:itop, :] = zrow
    pad_ref[:, ibot:ibot + 1, :] = zrow

    # ---- stage 1: Conv1 -> BN1 -> PReLU (staged in-place in the scratch) ----
    pad_ref[:, itop:ibot, :] = x_ref[...]                 # aligned interior store
    interior_store(conv(wb1_ref, bw1_ref))                # review #2: stage acc
    scale_w, shift_w = bn_coeffs(g1_ref, be1_ref)
    a = a_ref[0, 0]                                       # PReLU shared slope
    h = interior_load() * scale_w + shift_w
    interior_store(jnp.where(h >= 0.0, h, a * h))         # in-place RMW

    # ---- stage 2: Conv2 -> BN2 -> residual add -------------------------------
    interior_store(conv(wb2_ref, bw2_ref))
    scale_w, shift_w = bn_coeffs(g2_ref, be2_ref)
    h = interior_load() * scale_w + shift_w
    # o_ref aliases x_ref (review #3); elementwise read-then-write is safe.
    o_ref[...] = x_ref[...] + h.reshape(N, H, WC)


def _residual_block_nhwc_impl(x_nhwc, prepped):
    (wb1, bw1, g1, be1, a, wb2, bw2, g2, be2, sel) = prepped
    N, H, W, C = x_nhwc.shape
    WC = W * C
    assert H % 8 == 0 and WC % 128 == 0, "layout assumptions (see header)"
    x3 = x_nhwc.astype(jnp.float32).reshape(N, H, WC)     # lane-dense rows
    rows = _PAD_TOP + H + 1                               # 8-row top + 1-row bottom halo

    vmem = pl.BlockSpec(memory_space=pltpu.MemorySpace.VMEM)
    smem = pl.BlockSpec(memory_space=pltpu.MemorySpace.SMEM)

    # VMEM limit derived from the actual footprint (review: no magic 32 MiB).
    act = N * H * WC * 4
    foot = (2 * act                       # activation in/out windows (aliased in HBM)
            + N * rows * WC * 4           # pad scratch (f32)
            + 2 * 3 * WC * WC * 2         # bf16 banded weights (both convs)
            + (2 * WC + 4 * C + WC * C) * 4 + 64)
    vmem_limit = int(min(64 * 1024 * 1024, max(4 * 1024 * 1024, 2 * foot)))

    y3 = pl.pallas_call(
        functools.partial(_resblock_kernel, N=N, H=H, W=W, C=C),
        out_shape=jax.ShapeDtypeStruct((N, H, WC), jnp.float32),
        in_specs=[vmem, vmem, vmem, vmem, vmem, smem,
                  vmem, vmem, vmem, vmem, vmem],
        out_specs=vmem,
        scratch_shapes=[pltpu.VMEM((N, rows, WC), jnp.float32)],
        input_output_aliases={0: 0},                      # review #3
        compiler_params=pltpu.CompilerParams(vmem_limit_bytes=vmem_limit),
    )(x3, wb1, bw1, g1, be1, a, wb2, bw2, g2, be2, sel)
    return y3.reshape(N, H, W, C)


# Native (transpose-free) entry point: chain ResidualBlocks in NHWC with this.
residual_block_nhwc = jax.jit(_residual_block_nhwc_impl)


@jax.jit
def residual_block_nchw(x_nchw, prepped):
    """PyTorch-layout shim.  The two transposes are layout plumbing that a real
    multi-block SRGAN should hoist to the network boundary (review #4)."""
    x = jnp.transpose(x_nchw, (0, 2, 3, 1))               # NCHW -> NHWC
    y = _residual_block_nhwc_impl(x, prepped)
    return jnp.transpose(y, (0, 3, 1, 2))                 # back to NCHW


def residual_block_ref(x_nchw, params, conv_input_dtype=jnp.float32):
    """Pure-JAX reference.  conv_input_dtype=bfloat16 mirrors the kernel's bf16
    MXU inputs (f32 accumulation); float32 is the exact module math."""
    w1, b1, g1, be1, a, w2, b2, g2, be2 = params
    x = jnp.transpose(x_nchw, (0, 2, 3, 1)).astype(jnp.float32)

    def conv(h, w, b):
        y = jax.lax.conv_general_dilated(
            h.astype(conv_input_dtype), w.astype(conv_input_dtype), (1, 1), "SAME",
            dimension_numbers=("NHWC", "HWIO", "NHWC"),
            preferred_element_type=jnp.float32,
            precision=jax.lax.Precision.HIGHEST)
        return y + b.reshape(1, 1, 1, -1)

    def bn(h, g, be):
        mean = jnp.mean(h, axis=(0, 1, 2), keepdims=True)
        var = jnp.mean((h - mean) ** 2, axis=(0, 1, 2), keepdims=True)
        return ((h - mean) / jnp.sqrt(var + EPS) * g.reshape(1, 1, 1, -1)
                + be.reshape(1, 1, 1, -1))

    h = bn(conv(x, w1, b1), g1, be1)
    h = jnp.where(h >= 0.0, h, a[0, 0] * h)
    h = bn(conv(h, w2, b2), g2, be2)
    return jnp.transpose(x + h, (0, 3, 1, 2))


if __name__ == "__main__":
    N, C, H, W = 2, 16, 16, 16  # in_features = 16

    key = jax.random.PRNGKey(0)
    ks = jax.random.split(key, 9)
    # Deterministic synthetic parameters (shapes follow the module's __init__).
    w1 = 0.1 * jax.random.normal(ks[0], (3, 3, C, C), jnp.float32)   # Conv1 HWIO
    b1 = 0.1 * jax.random.normal(ks[1], (1, C), jnp.float32)
    g1 = 1.0 + 0.1 * jax.random.normal(ks[2], (1, C), jnp.float32)   # BN1 gamma
    be1 = 0.1 * jax.random.normal(ks[3], (1, C), jnp.float32)        # BN1 beta
    a = jnp.full((1, 1), 0.25, jnp.float32)                          # PReLU slope (default)
    w2 = 0.1 * jax.random.normal(ks[4], (3, 3, C, C), jnp.float32)   # Conv2 HWIO
    b2 = 0.1 * jax.random.normal(ks[5], (1, C), jnp.float32)
    g2 = 1.0 + 0.1 * jax.random.normal(ks[6], (1, C), jnp.float32)   # BN2 gamma
    be2 = 0.1 * jax.random.normal(ks[7], (1, C), jnp.float32)        # BN2 beta
    params = (w1, b1, g1, be1, a, w2, b2, g2, be2)

    prepped = prepare_params(params, W)                   # one-time prep (review #5)
    x = jax.random.normal(ks[8], (N, C, H, W), jnp.float32)          # NCHW like PyTorch

    out = jax.block_until_ready(residual_block_nchw(x, prepped))
    ref_bf16 = jax.block_until_ready(residual_block_ref(x, params, jnp.bfloat16))
    ref_f32 = jax.block_until_ready(residual_block_ref(x, params, jnp.float32))

    assert out.shape == x.shape and out.dtype == jnp.float32
    # Implementation check vs a precision-matched reference (bf16 conv inputs,
    # f32 accumulation and BN) -- validates the kernel tightly.
    err_impl = float(jnp.max(jnp.abs(out - ref_bf16)))
    assert jnp.allclose(out, ref_bf16, atol=2e-3, rtol=2e-3), f"impl err {err_impl}"
    # Sanity bound vs the full-f32 module math; the gap is the expected O(1e-2)
    # bf16-input rounding requested by the perf review (item #8).
    err_full = float(jnp.max(jnp.abs(out - ref_f32)))
    assert jnp.allclose(out, ref_f32, atol=1e-1, rtol=1e-2), f"f32-ref err {err_full}"
    print("KERNEL_OK")
</pallas_src>

<mosaic_0001>
module attributes {stable_mosaic.version = 11 : i64} {
  func.func @_resblock_kernel(%arg0: memref<2x16x256xf32, #tpu.memory_space<vmem>>, %arg1: memref<3x256x256xbf16, #tpu.memory_space<vmem>>, %arg2: memref<1x256xf32, #tpu.memory_space<vmem>>, %arg3: memref<1x16xf32, #tpu.memory_space<vmem>>, %arg4: memref<1x16xf32, #tpu.memory_space<vmem>>, %arg5: memref<1x1xf32, #tpu.memory_space<smem>>, %arg6: memref<3x256x256xbf16, #tpu.memory_space<vmem>>, %arg7: memref<1x256xf32, #tpu.memory_space<vmem>>, %arg8: memref<1x16xf32, #tpu.memory_space<vmem>>, %arg9: memref<1x16xf32, #tpu.memory_space<vmem>>, %arg10: memref<256x16xf32, #tpu.memory_space<vmem>>, %arg11: memref<2x16x256xf32, #tpu.memory_space<vmem>>, %arg12: memref<2x25x256xf32, #tpu.memory_space<vmem>>) attributes {dimension_semantics = [], scalar_prefetch = 0 : i64, scratch_operands = 1 : i64, tpu.core_type = #tpu.core_type<tc>} {
    %c0 = arith.constant 0 : index
    %c0_0 = arith.constant 0 : index
    %0 = vector.load %arg10[%c0, %c0_0] : memref<256x16xf32, #tpu.memory_space<vmem>>, vector<256x16xf32>
    %cst = arith.constant 0.000000e+00 : f32
    %1 = vector.broadcast %cst : f32 to vector<2x1x256xf32>
    %c0_1 = arith.constant 0 : index
    %c7 = arith.constant 7 : index
    %c0_2 = arith.constant 0 : index
    %2 = vector.load %arg12[%c0_1, %c7, %c0_2] : memref<2x25x256xf32, #tpu.memory_space<vmem>>, vector<2x1x256xf32>
    tpu.vector_store %arg12[%c0_1, %c7, %c0_2], %1 {strides = array<i32>} : memref<2x25x256xf32, #tpu.memory_space<vmem>>, vector<2x1x256xf32>,
    %c0_3 = arith.constant 0 : index
    %c24 = arith.constant 24 : index
    %c0_4 = arith.constant 0 : index
    %3 = vector.load %arg12[%c0_3, %c24, %c0_4] : memref<2x25x256xf32, #tpu.memory_space<vmem>>, vector<2x1x256xf32>
    tpu.vector_store %arg12[%c0_3, %c24, %c0_4], %1 {strides = array<i32>} : memref<2x25x256xf32, #tpu.memory_space<vmem>>, vector<2x1x256xf32>,
    %c0_5 = arith.constant 0 : index
    %c0_6 = arith.constant 0 : index
    %c0_7 = arith.constant 0 : index
    %4 = vector.load %arg0[%c0_5, %c0_6, %c0_7] : memref<2x16x256xf32, #tpu.memory_space<vmem>>, vector<2x16x256xf32>
    %c0_8 = arith.constant 0 : index
    %c8 = arith.constant 8 : index
    %c0_9 = arith.constant 0 : index
    %5 = vector.load %arg12[%c0_8, %c8, %c0_9] : memref<2x25x256xf32, #tpu.memory_space<vmem>>, vector<2x16x256xf32>
    tpu.vector_store %arg12[%c0_8, %c8, %c0_9], %4 {strides = array<i32>} : memref<2x25x256xf32, #tpu.memory_space<vmem>>, vector<2x16x256xf32>,
    %c0_10 = arith.constant 0 : index
    %c0_11 = arith.constant 0 : index
    %6 = vector.load %arg2[%c0_10, %c0_11] : memref<1x256xf32, #tpu.memory_space<vmem>>, vector<1x256xf32>
    %c0_12 = arith.constant 0 : index
    %c7_13 = arith.constant 7 : index
    %c0_14 = arith.constant 0 : index
    %7 = vector.load %arg12[%c0_12, %c7_13, %c0_14] : memref<2x25x256xf32, #tpu.memory_space<vmem>>, vector<2x16x256xf32>
    %8 = vector.shape_cast %7 : vector<2x16x256xf32> to vector<32x256xf32>
    %9 = arith.truncf %8 : vector<32x256xf32> to vector<32x256xbf16>
    %c0_15 = arith.constant 0 : index
    %c0_16 = arith.constant 0 : index
    %c0_17 = arith.constant 0 : index
    %10 = vector.load %arg1[%c0_15, %c0_16, %c0_17] : memref<3x256x256xbf16, #tpu.memory_space<vmem>>, vector<1x256x256xbf16>
    %11 = vector.shape_cast %10 : vector<1x256x256xbf16> to vector<256x256xbf16>
    %cst_18 = arith.constant dense<0.000000e+00> : vector<32x256xf32>
    %12 = tpu.matmul %9, %11, %cst_18 {dimension_numbers = #tpu.dot_dimension_numbers<[1], [0], [0], [1], [0, 0, 1, 1], [], []>} : vector<32x256xbf16>, vector<256x256xbf16>, vector<32x256xf32> -> vector<32x256xf32>
    %13 = vector.broadcast %6 : vector<1x256xf32> to vector<32x256xf32>
    %14 = arith.addf %13, %12 : vector<32x256xf32>
    %c0_19 = arith.constant 0 : index
    %c8_20 = arith.constant 8 : index
    %c0_21 = arith.constant 0 : index
    %15 = vector.load %arg12[%c0_19, %c8_20, %c0_21] : memref<2x25x256xf32, #tpu.memory_space<vmem>>, vector<2x16x256xf32>
    %16 = vector.shape_cast %15 : vector<2x16x256xf32> to vector<32x256xf32>
    %17 = arith.truncf %16 : vector<32x256xf32> to vector<32x256xbf16>
    %c1 = arith.constant 1 : index
    %c0_22 = arith.constant 0 : index
    %c0_23 = arith.constant 0 : index
    %18 = vector.load %arg1[%c1, %c0_22, %c0_23] : memref<3x256x256xbf16, #tpu.memory_space<vmem>>, vector<1x256x256xbf16>
    %19 = vector.shape_cast %18 : vector<1x256x256xbf16> to vector<256x256xbf16>
    %cst_24 = arith.constant dense<0.000000e+00> : vector<32x256xf32>
    %20 = tpu.matmul %17, %19, %cst_24 {dimension_numbers = #tpu.dot_dimension_numbers<[1], [0], [0], [1], [0, 0, 1, 1], [], []>} : vector<32x256xbf16>, vector<256x256xbf16>, vector<32x256xf32> -> vector<32x256xf32>
    %21 = arith.addf %14, %20 : vector<32x256xf32>
    %c0_25 = arith.constant 0 : index
    %c9 = arith.constant 9 : index
    %c0_26 = arith.constant 0 : index
    %22 = vector.load %arg12[%c0_25, %c9, %c0_26] : memref<2x25x256xf32, #tpu.memory_space<vmem>>, vector<2x16x256xf32>
    %23 = vector.shape_cast %22 : vector<2x16x256xf32> to vector<32x256xf32>
    %24 = arith.truncf %23 : vector<32x256xf32> to vector<32x256xbf16>
    %c2 = arith.constant 2 : index
    %c0_27 = arith.constant 0 : index
    %c0_28 = arith.constant 0 : index
    %25 = vector.load %arg1[%c2, %c0_27, %c0_28] : memref<3x256x256xbf16, #tpu.memory_space<vmem>>, vector<1x256x256xbf16>
    %26 = vector.shape_cast %25 : vector<1x256x256xbf16> to vector<256x256xbf16>
    %cst_29 = arith.constant dense<0.000000e+00> : vector<32x256xf32>
    %27 = tpu.matmul %24, %26, %cst_29 {dimension_numbers = #tpu.dot_dimension_numbers<[1], [0], [0], [1], [0, 0, 1, 1], [], []>} : vector<32x256xbf16>, vector<256x256xbf16>, vector<32x256xf32> -> vector<32x256xf32>
    %28 = arith.addf %21, %27 : vector<32x256xf32>
    %29 = vector.shape_cast %28 : vector<32x256xf32> to vector<2x16x256xf32>
    %c0_30 = arith.constant 0 : index
    %c8_31 = arith.constant 8 : index
    %c0_32 = arith.constant 0 : index
    %30 = vector.load %arg12[%c0_30, %c8_31, %c0_32] : memref<2x25x256xf32, #tpu.memory_space<vmem>>, vector<2x16x256xf32>
    tpu.vector_store %arg12[%c0_30, %c8_31, %c0_32], %29 {strides = array<i32>} : memref<2x25x256xf32, #tpu.memory_space<vmem>>, vector<2x16x256xf32>,
    %c0_33 = arith.constant 0 : index
    %c8_34 = arith.constant 8 : index
    %c0_35 = arith.constant 0 : index
    %31 = vector.load %arg12[%c0_33, %c8_34, %c0_35] : memref<2x25x256xf32, #tpu.memory_space<vmem>>, vector<2x16x256xf32>
    %32 = vector.shape_cast %31 : vector<2x16x256xf32> to vector<32x256xf32>
    %cst_36 = arith.constant dense<0.000000e+00> : vector<256xf32>
    %33 = vector.multi_reduction <add>, %32, %cst_36 [0] : vector<32x256xf32> to vector<256xf32>
    %34 = vector.shape_cast %33 : vector<256xf32> to vector<1x256xf32>
    %35 = arith.mulf %32, %32 : vector<32x256xf32>
    %cst_37 = arith.constant dense<0.000000e+00> : vector<256xf32>
    %36 = vector.multi_reduction <add>, %35, %cst_37 [0] : vector<32x256xf32> to vector<256xf32>
    %37 = vector.shape_cast %36 : vector<256xf32> to vector<1x256xf32>
    %38 = tpu.concatenate %34, %37 in 0 : vector<1x256xf32>, vector<1x256xf32> -> vector<2x256xf32>
    %cst_38 = arith.constant dense<0.000000e+00> : vector<2x16xf32>
    %39 = tpu.matmul %38, %0, %cst_38 {dimension_numbers = #tpu.dot_dimension_numbers<[1], [0], [0], [1], [0, 0, 1, 1], [], []>} : vector<2x256xf32>, vector<256x16xf32>, vector<2x16xf32> -> vector<2x16xf32>
    %cst_39 = arith.constant 0.001953125 : f32
    %40 = vector.broadcast %cst_39 : f32 to vector<2x16xf32>
    %41 = arith.mulf %39, %40 : vector<2x16xf32>
    %42 = vector.extract_strided_slice %41 {offsets = [0, 0], sizes = [1, 16], strides = [1, 1]} : vector<2x16xf32> to vector<1x16xf32>
    %43 = vector.extract_strided_slice %41 {offsets = [1, 0], sizes = [1, 16], strides = [1, 1]} : vector<2x16xf32> to vector<1x16xf32>
    %44 = arith.mulf %42, %42 : vector<1x16xf32>
    %45 = arith.subf %43, %44 : vector<1x16xf32>
    %c0_40 = arith.constant 0 : index
    %c0_41 = arith.constant 0 : index
    %46 = vector.load %arg3[%c0_40, %c0_41] : memref<1x16xf32, #tpu.memory_space<vmem>>, vector<1x16xf32>
    %cst_42 = arith.constant 8.000000e-01 : f32
    %47 = vector.broadcast %cst_42 : f32 to vector<1x16xf32>
    %48 = arith.addf %45, %47 : vector<1x16xf32>
    %49 = math.rsqrt %48 : vector<1x16xf32>
    %50 = arith.mulf %46, %49 : vector<1x16xf32>
    %c0_43 = arith.constant 0 : index
    %c0_44 = arith.constant 0 : index
    %51 = vector.load %arg4[%c0_43, %c0_44] : memref<1x16xf32, #tpu.memory_space<vmem>>, vector<1x16xf32>
    %52 = arith.mulf %42, %50 : vector<1x16xf32>
    %53 = arith.subf %51, %52 : vector<1x16xf32>
    %54 = tpu.concatenate %50, %53 in 0 : vector<1x16xf32>, vector<1x16xf32> -> vector<2x16xf32>
    %cst_45 = arith.constant dense<0.000000e+00> : vector<2x256xf32>
    %55 = tpu.matmul %54, %0, %cst_45 {dimension_numbers = #tpu.dot_dimension_numbers<[1], [1], [0], [0], [0, 0, 1, 0], [], []>} : vector<2x16xf32>, vector<256x16xf32>, vector<2x256xf32> -> vector<2x256xf32>
    %56 = vector.extract_strided_slice %55 {offsets = [0, 0], sizes = [1, 256], strides = [1, 1]} : vector<2x256xf32> to vector<1x256xf32>
    %57 = vector.extract_strided_slice %55 {offsets = [1, 0], sizes = [1, 256], strides = [1, 1]} : vector<2x256xf32> to vector<1x256xf32>
    %c0_46 = arith.constant 0 : index
    %c0_47 = arith.constant 0 : index
    %58 = memref.load %arg5[%c0_46, %c0_47] : memref<1x1xf32, #tpu.memory_space<smem>>
    %c0_48 = arith.constant 0 : index
    %c8_49 = arith.constant 8 : index
    %c0_50 = arith.constant 0 : index
    %59 = vector.load %arg12[%c0_48, %c8_49, %c0_50] : memref<2x25x256xf32, #tpu.memory_space<vmem>>, vector<2x16x256xf32>
    %60 = vector.shape_cast %59 : vector<2x16x256xf32> to vector<32x256xf32>
    %61 = vector.broadcast %56 : vector<1x256xf32> to vector<32x256xf32>
    %62 = arith.mulf %60, %61 : vector<32x256xf32>
    %63 = vector.broadcast %57 : vector<1x256xf32> to vector<32x256xf32>
    %64 = arith.addf %62, %63 : vector<32x256xf32>
    %cst_51 = arith.constant 0.000000e+00 : f32
    %65 = vector.broadcast %cst_51 : f32 to vector<32x256xf32>
    %66 = arith.cmpf oge, %64, %65 : vector<32x256xf32>
    %67 = vector.broadcast %58 : f32 to vector<32x256xf32>
    %68 = arith.mulf %67, %64 : vector<32x256xf32>
    %69 = arith.select %66, %64, %68 : vector<32x256xi1>, vector<32x256xf32>
    %70 = vector.shape_cast %69 : vector<32x256xf32> to vector<2x16x256xf32>
    %c0_52 = arith.constant 0 : index
    %c8_53 = arith.constant 8 : index
    %c0_54 = arith.constant 0 : index
    %71 = vector.load %arg12[%c0_52, %c8_53, %c0_54] : memref<2x25x256xf32, #tpu.memory_space<vmem>>, vector<2x16x256xf32>
    tpu.vector_store %arg12[%c0_52, %c8_53, %c0_54], %70 {strides = array<i32>} : memref<2x25x256xf32, #tpu.memory_space<vmem>>, vector<2x16x256xf32>,
    %c0_55 = arith.constant 0 : index
    %c0_56 = arith.constant 0 : index
    %72 = vector.load %arg7[%c0_55, %c0_56] : memref<1x256xf32, #tpu.memory_space<vmem>>, vector<1x256xf32>
    %c0_57 = arith.constant 0 : index
    %c7_58 = arith.constant 7 : index
    %c0_59 = arith.constant 0 : index
    %73 = vector.load %arg12[%c0_57, %c7_58, %c0_59] : memref<2x25x256xf32, #tpu.memory_space<vmem>>, vector<2x16x256xf32>
    %74 = vector.shape_cast %73 : vector<2x16x256xf32> to vector<32x256xf32>
    %75 = arith.truncf %74 : vector<32x256xf32> to vector<32x256xbf16>
    %c0_60 = arith.constant 0 : index
    %c0_61 = arith.constant 0 : index
    %c0_62 = arith.constant 0 : index
    %76 = vector.load %arg6[%c0_60, %c0_61, %c0_62] : memref<3x256x256xbf16, #tpu.memory_space<vmem>>, vector<1x256x256xbf16>
    %77 = vector.shape_cast %76 : vector<1x256x256xbf16> to vector<256x256xbf16>
    %cst_63 = arith.constant dense<0.000000e+00> : vector<32x256xf32>
    %78 = tpu.matmul %75, %77, %cst_63 {dimension_numbers = #tpu.dot_dimension_numbers<[1], [0], [0], [1], [0, 0, 1, 1], [], []>} : vector<32x256xbf16>, vector<256x256xbf16>, vector<32x256xf32> -> vector<32x256xf32>
    %79 = vector.broadcast %72 : vector<1x256xf32> to vector<32x256xf32>
    %80 = arith.addf %79, %78 : vector<32x256xf32>
    %c0_64 = arith.constant 0 : index
    %c8_65 = arith.constant 8 : index
    %c0_66 = arith.constant 0 : index
    %81 = vector.load %arg12[%c0_64, %c8_65, %c0_66] : memref<2x25x256xf32, #tpu.memory_space<vmem>>, vector<2x16x256xf32>
    %82 = vector.shape_cast %81 : vector<2x16x256xf32> to vector<32x256xf32>
    %83 = arith.truncf %82 : vector<32x256xf32> to vector<32x256xbf16>
    %c1_67 = arith.constant 1 : index
    %c0_68 = arith.constant 0 : index
    %c0_69 = arith.constant 0 : index
    %84 = vector.load %arg6[%c1_67, %c0_68, %c0_69] : memref<3x256x256xbf16, #tpu.memory_space<vmem>>, vector<1x256x256xbf16>
    %85 = vector.shape_cast %84 : vector<1x256x256xbf16> to vector<256x256xbf16>
    %cst_70 = arith.constant dense<0.000000e+00> : vector<32x256xf32>
    %86 = tpu.matmul %83, %85, %cst_70 {dimension_numbers = #tpu.dot_dimension_numbers<[1], [0], [0], [1], [0, 0, 1, 1], [], []>} : vector<32x256xbf16>, vector<256x256xbf16>, vector<32x256xf32> -> vector<32x256xf32>
    %87 = arith.addf %80, %86 : vector<32x256xf32>
    %c0_71 = arith.constant 0 : index
    %c9_72 = arith.constant 9 : index
    %c0_73 = arith.constant 0 : index
    %88 = vector.load %arg12[%c0_71, %c9_72, %c0_73] : memref<2x25x256xf32, #tpu.memory_space<vmem>>, vector<2x16x256xf32>
    %89 = vector.shape_cast %88 : vector<2x16x256xf32> to vector<32x256xf32>
    %90 = arith.truncf %89 : vector<32x256xf32> to vector<32x256xbf16>
    %c2_74 = arith.constant 2 : index
    %c0_75 = arith.constant 0 : index
    %c0_76 = arith.constant 0 : index
    %91 = vector.load %arg6[%c2_74, %c0_75, %c0_76] : memref<3x256x256xbf16, #tpu.memory_space<vmem>>, vector<1x256x256xbf16>
    %92 = vector.shape_cast %91 : vector<1x256x256xbf16> to vector<256x256xbf16>
    %cst_77 = arith.constant dense<0.000000e+00> : vector<32x256xf32>
    %93 = tpu.matmul %90, %92, %cst_77 {dimension_numbers = #tpu.dot_dimension_numbers<[1], [0], [0], [1], [0, 0, 1, 1], [], []>} : vector<32x256xbf16>, vector<256x256xbf16>, vector<32x256xf32> -> vector<32x256xf32>
    %94 = arith.addf %87, %93 : vector<32x256xf32>
    %95 = vector.shape_cast %94 : vector<32x256xf32> to vector<2x16x256xf32>
    %c0_78 = arith.constant 0 : index
    %c8_79 = arith.constant 8 : index
    %c0_80 = arith.constant 0 : index
    %96 = vector.load %arg12[%c0_78, %c8_79, %c0_80] : memref<2x25x256xf32, #tpu.memory_space<vmem>>, vector<2x16x256xf32>
    tpu.vector_store %arg12[%c0_78, %c8_79, %c0_80], %95 {strides = array<i32>} : memref<2x25x256xf32, #tpu.memory_space<vmem>>, vector<2x16x256xf32>,
    %c0_81 = arith.constant 0 : index
    %c8_82 = arith.constant 8 : index
    %c0_83 = arith.constant 0 : index
    %97 = vector.load %arg12[%c0_81, %c8_82, %c0_83] : memref<2x25x256xf32, #tpu.memory_space<vmem>>, vector<2x16x256xf32>
    %98 = vector.shape_cast %97 : vector<2x16x256xf32> to vector<32x256xf32>
    %cst_84 = arith.constant dense<0.000000e+00> : vector<256xf32>
    %99 = vector.multi_reduction <add>, %98, %cst_84 [0] : vector<32x256xf32> to vector<256xf32>
    %100 = vector.shape_cast %99 : vector<256xf32> to vector<1x256xf32>
    %101 = arith.mulf %98, %98 : vector<32x256xf32>
    %cst_85 = arith.constant dense<0.000000e+00> : vector<256xf32>
    %102 = vector.multi_reduction <add>, %101, %cst_85 [0] : vector<32x256xf32> to vector<256xf32>
    %103 = vector.shape_cast %102 : vector<256xf32> to vector<1x256xf32>
    %104 = tpu.concatenate %100, %103 in 0 : vector<1x256xf32>, vector<1x256xf32> -> vector<2x256xf32>
    %cst_86 = arith.constant dense<0.000000e+00> : vector<2x16xf32>
    %105 = tpu.matmul %104, %0, %cst_86 {dimension_numbers = #tpu.dot_dimension_numbers<[1], [0], [0], [1], [0, 0, 1, 1], [], []>} : vector<2x256xf32>, vector<256x16xf32>, vector<2x16xf32> -> vector<2x16xf32>
    %cst_87 = arith.constant 0.001953125 : f32
    %106 = vector.broadcast %cst_87 : f32 to vector<2x16xf32>
    %107 = arith.mulf %105, %106 : vector<2x16xf32>
    %108 = vector.extract_strided_slice %107 {offsets = [0, 0], sizes = [1, 16], strides = [1, 1]} : vector<2x16xf32> to vector<1x16xf32>
    %109 = vector.extract_strided_slice %107 {offsets = [1, 0], sizes = [1, 16], strides = [1, 1]} : vector<2x16xf32> to vector<1x16xf32>
    %110 = arith.mulf %108, %108 : vector<1x16xf32>
    %111 = arith.subf %109, %110 : vector<1x16xf32>
    %c0_88 = arith.constant 0 : index
    %c0_89 = arith.constant 0 : index
    %112 = vector.load %arg8[%c0_88, %c0_89] : memref<1x16xf32, #tpu.memory_space<vmem>>, vector<1x16xf32>
    %cst_90 = arith.constant 8.000000e-01 : f32
    %113 = vector.broadcast %cst_90 : f32 to vector<1x16xf32>
    %114 = arith.addf %111, %113 : vector<1x16xf32>
    %115 = math.rsqrt %114 : vector<1x16xf32>
    %116 = arith.mulf %112, %115 : vector<1x16xf32>
    %c0_91 = arith.constant 0 : index
    %c0_92 = arith.constant 0 : index
    %117 = vector.load %arg9[%c0_91, %c0_92] : memref<1x16xf32, #tpu.memory_space<vmem>>, vector<1x16xf32>
    %118 = arith.mulf %108, %116 : vector<1x16xf32>
    %119 = arith.subf %117, %118 : vector<1x16xf32>
    %120 = tpu.concatenate %116, %119 in 0 : vector<1x16xf32>, vector<1x16xf32> -> vector<2x16xf32>
    %cst_93 = arith.constant dense<0.000000e+00> : vector<2x256xf32>
    %121 = tpu.matmul %120, %0, %cst_93 {dimension_numbers = #tpu.dot_dimension_numbers<[1], [1], [0], [0], [0, 0, 1, 0], [], []>} : vector<2x16xf32>, vector<256x16xf32>, vector<2x256xf32> -> vector<2x256xf32>
    %122 = vector.extract_strided_slice %121 {offsets = [0, 0], sizes = [1, 256], strides = [1, 1]} : vector<2x256xf32> to vector<1x256xf32>
    %123 = vector.extract_strided_slice %121 {offsets = [1, 0], sizes = [1, 256], strides = [1, 1]} : vector<2x256xf32> to vector<1x256xf32>
    %c0_94 = arith.constant 0 : index
    %c8_95 = arith.constant 8 : index
    %c0_96 = arith.constant 0 : index
    %124 = vector.load %arg12[%c0_94, %c8_95, %c0_96] : memref<2x25x256xf32, #tpu.memory_space<vmem>>, vector<2x16x256xf32>
    %125 = vector.shape_cast %124 : vector<2x16x256xf32> to vector<32x256xf32>
    %126 = vector.broadcast %122 : vector<1x256xf32> to vector<32x256xf32>
    %127 = arith.mulf %125, %126 : vector<32x256xf32>
    %128 = vector.broadcast %123 : vector<1x256xf32> to vector<32x256xf32>
    %129 = arith.addf %127, %128 : vector<32x256xf32>
    %c0_97 = arith.constant 0 : index
    %c0_98 = arith.constant 0 : index
    %c0_99 = arith.constant 0 : index
    %130 = vector.load %arg0[%c0_97, %c0_98, %c0_99] : memref<2x16x256xf32, #tpu.memory_space<vmem>>, vector<2x16x256xf32>
    %131 = vector.shape_cast %129 : vector<32x256xf32> to vector<2x16x256xf32>
    %132 = arith.addf %130, %131 : vector<2x16x256xf32>
    %c0_100 = arith.constant 0 : index
    %c0_101 = arith.constant 0 : index
    %c0_102 = arith.constant 0 : index
    %133 = vector.load %arg11[%c0_100, %c0_101, %c0_102] : memref<2x16x256xf32, #tpu.memory_space<vmem>>, vector<2x16x256xf32>
    tpu.vector_store %arg11[%c0_100, %c0_101, %c0_102], %132 {strides = array<i32>} : memref<2x16x256xf32, #tpu.memory_space<vmem>>, vector<2x16x256xf32>,
    return
  }
}

</mosaic_0001>

<bundles_post_ra>
// kernel: residual_block_nchw.1
= control target key start
LH: loop header
LB: loop body
LE: loop exit
PB: predicated region body
PF: predicated region fallthrough
CT: control target
= control target key end

     0   :  { %v71_v0 = vlaneseq  ;;  %v3449_v5 = vmov 0.0   ;;  %vm128_vm1 = vcmask 1040384   ;;  %vm711_vm2 = vcmask 1046528   ;;  %s4924_s1 = inlined_call_operand.vmem [shape: bf16[3,256,256], index: 1, kind: input, shape index: {}]   ;;  %s4925_s0 = inlined_call_operand.vmem [shape: f32[2,16,256], index: 0, kind: input, shape index: {}, may-alias: {0,11}]   ;;  %s4926_s10 = inlined_call_operand.vmem [shape: f32[256,16], index: 10, kind: input, shape index: {}]   ;;  %s4927_s2 = inlined_call_operand.vmem [shape: f32[1,256], index: 2, kind: input, shape index: {}]   ;;  %s4928_s6 = inlined_call_operand.vmem [shape: bf16[3,256,256], index: 6, kind: input, shape index: {}]   ;;  %s4929_s3 = inlined_call_operand.vmem [shape: f32[1,16], index: 3, kind: input, shape index: {}]   ;;  %s4930_s4 = inlined_call_operand.vmem [shape: f32[1,16], index: 4, kind: input, shape index: {}]   ;;  %s4931_s5 = inlined_call_operand.<no memory space> [shape: f32[1,1], index: 5, kind: input, shape index: {}]   ;;  %s4932_s7 = inlined_call_operand.vmem [shape: f32[1,256], index: 7, kind: input, shape index: {}]   ;;  %s4933_s8 = inlined_call_operand.vmem [shape: f32[1,16], index: 8, kind: input, shape index: {}]   ;;  %s4934_s9 = inlined_call_operand.vmem [shape: f32[1,16], index: 9, kind: input, shape index: {}]   ;;  %s4935_s11 = inlined_call_operand.vmem [shape: f32[2,16,256], index: 11, kind: output, shape index: {}, may-alias: {0,11}]  }
   0x1   :  { %v3126_v1 = vld [vmem:[%s4924_s1 + $0x74] ss:$8 sps:$4 sm:$0xff]   ;;  %v3128_v2 = vld [vmem:[%s4924_s1 + $0x70] ss:$8 sps:$4 sm:$0xff]   ;;  %v3132_v6 = vld [vmem:[%s4924_s1 + $0x64] ss:$8 sps:$4 sm:$0xff]  }
   0x2   :  { %vm73_vm0 = vcmp.lt.s32.totalorder %v71_v0, 256  ;;  %353 = vmatprep.subr.bf16.mxu0 %v3126_v1  ;;  %v3129_v3 = vld [vmem:[%s4924_s1 + $0x174] ss:$8 sps:$4 sm:$0xff]   ;;  %v3131_v4 = vld [vmem:[%s4924_s1 + $0x170] ss:$8 sps:$4 sm:$0xff]   ;;  %v88_v49 = vld [vmem:[%s4925_s0 + $0x8] sm:$0xff] }
   0x3   :  { %76 = vst.msk [vmem:[#allocation2 + $0x7] ss:$8 sm:$0x3] %vm73_vm0, %v3449_v5  ;;  %79 = vst.msk [vmem:[#allocation2 + $0x47] ss:$8 sm:$0x3] %vm73_vm0, %v3449_v5  ;;  %354 = vmatpush1.bf16.msra.mxu0 %v3128_v2  ;;  %626 = vmatprep.subr.bf16.mxu1 %v3129_v3 }
   0x4   :  { %82 = vst.msk [vmem:[#allocation2 + $0x30] ss:$8 sm:$0x3] %vm73_vm0, %v3449_v5  ;;  %85 = vst.msk [vmem:[#allocation2 + $0x70] ss:$8 sm:$0x3] %vm73_vm0, %v3449_v5  ;;  %627 = vmatpush1.bf16.msra.mxu1 %v3131_v4  ;;  %355 = vmatprep.subr.bf16.mxu0 %v3132_v6 }
   0x5   :  { %v3134_v7 = vld [vmem:[%s4924_s1 + $0x60] ss:$8 sps:$4 sm:$0xff]   ;;  %v3135_v8 = vld [vmem:[%s4924_s1 + $0x164] ss:$8 sps:$4 sm:$0xff]   ;;  %v3138_v10 = vld [vmem:[%s4924_s1 + $0x54] ss:$8 sps:$4 sm:$0xff]  }
   0x6   :  { %v3137_v9 = vld [vmem:[%s4924_s1 + $0x160] ss:$8 sps:$4 sm:$0xff]   ;;  %628 = vmatprep.subr.bf16.mxu1 %v3135_v8  ;;  %v3140_v11 = vld [vmem:[%s4924_s1 + $0x50] ss:$8 sps:$4 sm:$0xff]   ;;  %v3141_v12 = vld [vmem:[%s4924_s1 + $0x154] ss:$8 sps:$4 sm:$0xff]  }
   0x7   :  { %356 = vmatpush1.bf16.msra.mxu0 %v3134_v7  ;;  %v3144_v13 = vld [vmem:[%s4924_s1 + $0x44] ss:$8 sps:$4 sm:$0xff]   ;;  %v3143_v14 = vld [vmem:[%s4924_s1 + $0x150] ss:$8 sps:$4 sm:$0xff]   ;;  %v3146_v16 = vld [vmem:[%s4924_s1 + $0x40] ss:$8 sps:$4 sm:$0xff]  }
   0x8   :  { %357 = vmatprep.subr.bf16.mxu0 %v3138_v10  ;;  %629 = vmatpush1.bf16.msra.mxu1 %v3137_v9  ;;  %v3147_v15 = vld [vmem:[%s4924_s1 + $0x144] ss:$8 sps:$4 sm:$0xff]   ;;  %v3150_v17 = vld [vmem:[%s4924_s1 + $0x34] ss:$8 sps:$4 sm:$0xff]   ;;  %v3149_v18 = vld [vmem:[%s4924_s1 + $0x140] ss:$8 sps:$4 sm:$0xff]  }
   0x9   :  { %630 = vmatprep.subr.bf16.mxu1 %v3141_v12  ;;  %v3153_v19 = vld [vmem:[%s4924_s1 + $0x134] ss:$8 sps:$4 sm:$0xff]   ;;  %v3152_v20 = vld [vmem:[%s4924_s1 + $0x30] ss:$8 sps:$4 sm:$0xff]   ;;  %v3156_v21 = vld [vmem:[%s4924_s1 + $0x24] ss:$8 sps:$4 sm:$0xff]  }
   0xa   :  { %v3155_v22 = vld [vmem:[%s4924_s1 + $0x130] ss:$8 sps:$4 sm:$0xff]   ;;  %v3159_v23 = vld [vmem:[%s4924_s1 + $0x124] ss:$8 sps:$4 sm:$0xff]   ;;  %v3158_v24 = vld [vmem:[%s4924_s1 + $0x20] ss:$8 sps:$4 sm:$0xff]  }
   0xb   :  { %358 = vmatpush1.bf16.msra.mxu0 %v3140_v11  ;;  %v3162_v25 = vld [vmem:[%s4924_s1 + $0x14] ss:$8 sps:$4 sm:$0xff]   ;;  %v3161_v26 = vld [vmem:[%s4924_s1 + $0x120] ss:$8 sps:$4 sm:$0xff]   ;;  %v3164_v28 = vld [vmem:[%s4924_s1 + $0x10] ss:$8 sps:$4 sm:$0xff]  }
   0xc   :  { %359 = vmatprep.subr.bf16.mxu0 %v3144_v13  ;;  %631 = vmatpush1.bf16.msra.mxu1 %v3143_v14  ;;  %v3165_v27 = vld [vmem:[%s4924_s1 + $0x114] ss:$8 sps:$4 sm:$0xff]   ;;  %v3168_v29 = vld [vmem:[%s4924_s1 + $0x4] ss:$8 sps:$4 sm:$0xff]   ;;  %v3167_v30 = vld [vmem:[%s4924_s1 + $0x110] ss:$8 sps:$4 sm:$0xff]  }
   0xd   :  { %632 = vmatprep.subr.bf16.mxu1 %v3147_v15  ;;  %v3171_v31 = vld [vmem:[%s4924_s1 + $0x104] ss:$8 sps:$4 sm:$0xff]   ;;  %v3170_v32 = vld [vmem:[%s4924_s1] ss:$8 sps:$4 sm:$0xff]   ;;  %v3174_v33 = vld [vmem:[%s4924_s1 + $0xf4] ss:$8 sps:$4 sm:$0xff]  }
   0xe   :  { %v3173_v34 = vld [vmem:[%s4924_s1 + $0x100] ss:$8 sps:$4 sm:$0xff]   ;;  %v3177_v35 = vld [vmem:[%s4924_s1 + $0x1f4] ss:$8 sps:$4 sm:$0xff]   ;;  %v3176_v36 = vld [vmem:[%s4924_s1 + $0xf0] ss:$8 sps:$4 sm:$0xff]  }
   0xf   :  { %360 = vmatpush1.bf16.msra.mxu0 %v3146_v16  ;;  %v3180_v37 = vld [vmem:[%s4924_s1 + $0xe4] ss:$8 sps:$4 sm:$0xff]   ;;  %v3179_v38 = vld [vmem:[%s4924_s1 + $0x1f0] ss:$8 sps:$4 sm:$0xff]   ;;  %v3182_v40 = vld [vmem:[%s4924_s1 + $0xe0] ss:$8 sps:$4 sm:$0xff]  }
  0x10   :  { %361 = vmatprep.subr.bf16.mxu0 %v3150_v17  ;;  %633 = vmatpush1.bf16.msra.mxu1 %v3149_v18  ;;  %v3183_v39 = vld [vmem:[%s4924_s1 + $0x1e4] ss:$8 sps:$4 sm:$0xff]   ;;  %v3186_v41 = vld [vmem:[%s4924_s1 + $0xd4] ss:$8 sps:$4 sm:$0xff]   ;;  %v3185_v42 = vld [vmem:[%s4924_s1 + $0x1e0] ss:$8 sps:$4 sm:$0xff]  }
  0x11   :  { %634 = vmatprep.subr.bf16.mxu1 %v3153_v19  ;;  %v3189_v43 = vld [vmem:[%s4924_s1 + $0x1d4] ss:$8 sps:$4 sm:$0xff]   ;;  %v3188_v44 = vld [vmem:[%s4924_s1 + $0xd0] ss:$8 sps:$4 sm:$0xff]   ;;  %v3192_v45 = vld [vmem:[%s4924_s1 + $0xc4] ss:$8 sps:$4 sm:$0xff]  }
  0x12   :  { %v3191_v46 = vld [vmem:[%s4924_s1 + $0x1d0] ss:$8 sps:$4 sm:$0xff]   ;;  %v3194_v47 = vld [vmem:[%s4924_s1 + $0xc0] ss:$8 sps:$4 sm:$0xff]   ;;  %v3195_v48 = vld [vmem:[%s4924_s1 + $0x1c4] ss:$8 sps:$4 sm:$0xff]  }
  0x13   :  { %362 = vmatpush1.bf16.msra.mxu0 %v3152_v20  ;;  %v3659_v50 = vld [vmem:[%s4925_s0 + $0x18] sm:$0xff]  ;;  %96 = vst [vmem:[#allocation2 + $0x18] sm:$0xff] %v88_v49  ;;  %v3668_v52 = vld [vmem:[%s4925_s0] sm:$0xff]  ;;  %v3673_v53 = vld [vmem:[%s4925_s0 + $0x10] sm:$0xff]  ;;  %v133_v60 = vrot.slane %v88_v49, 7  ;;  %vm1167_vm3 = vcmask 130048  }
  0x14   :  { %363 = vmatprep.subr.bf16.mxu0 %v3156_v21  ;;  %635 = vmatpush1.bf16.msra.mxu1 %v3155_v22  ;;  %v3198_v51 = vld [vmem:[%s4924_s1 + $0xb4] ss:$8 sps:$4 sm:$0xff]   ;;  %98 = vst [vmem:[#allocation2 + $0x28] sm:$0xff] %v3659_v50  ;;  %v430_v54 = vpack.c.bf16 %v3659_v50, %v88_v49  ;;  %v105_v55 = vld [vmem:[#allocation2 + $0x8] sm:$0x80]  ;;  %95 = vst [vmem:[#allocation2 + $0x10] sm:$0xff] %v3668_v52 }
  0x15   :  { %636 = vmatprep.subr.bf16.mxu1 %v3159_v23  ;;  %97 = vst [vmem:[#allocation2 + $0x20] sm:$0xff] %v3673_v53  ;;  %v3197_v56 = vld [vmem:[%s4924_s1 + $0x1c0] ss:$8 sps:$4 sm:$0xff]   ;;  %v3201_v57 = vld [vmem:[%s4924_s1 + $0x1b4] ss:$8 sps:$4 sm:$0xff]   ;;  %v132_v59 = vrot.slane %v105_v55, 7 }
  0x16   :  { %658 = vmatprep.mubr.bf16.mxu1 %v430_v54  ;;  %v3200_v58 = vld [vmem:[%s4924_s1 + $0xb0] ss:$8 sps:$4 sm:$0xff]   ;;  %v3204_v61 = vld [vmem:[%s4924_s1 + $0xa4] ss:$8 sps:$4 sm:$0xff]   ;;  %v3206_v63 = vld [vmem:[%s4924_s1 + $0xa0] ss:$8 sps:$4 sm:$0xff]  }
  0x17   :  { %364 = vmatpush1.bf16.msra.mxu0 %v3158_v24  ;;  %v3203_v62 = vld [vmem:[%s4924_s1 + $0x1b0] ss:$8 sps:$4 sm:$0xff]   ;;  %v3207_v1 = vld [vmem:[%s4924_s1 + $0x1a4] ss:$8 sps:$4 sm:$0xff]   ;;  %v3209_v3 = vld [vmem:[%s4924_s1 + $0x1a0] ss:$8 sps:$4 sm:$0xff]   ;;  %v134_v5 = vsel %vm128_vm1, %v132_v59, %v133_v60 }
  0x18   :  { %365 = vmatprep.subr.bf16.mxu0 %v3162_v25  ;;  %637 = vmatpush1.bf16.msra.mxu1 %v3161_v26  ;;  %v3210_v4 = vld [vmem:[%s4924_s1 + $0x94] ss:$8 sps:$4 sm:$0xff]   ;;  %v104_v7 = vld [vmem:[#allocation2] sm:$0x80]  ;;  %v3212_v9 = vld [vmem:[%s4924_s1 + $0x90] ss:$8 sps:$4 sm:$0xff]  }
  0x19   :  { %638 = vmatprep.subr.bf16.mxu1 %v3165_v27  ;;  %v3213_v11 = vld [vmem:[%s4924_s1 + $0x194] ss:$8 sps:$4 sm:$0xff]   ;;  %v3215_v13 = vld [vmem:[%s4924_s1 + $0x190] ss:$8 sps:$4 sm:$0xff]   ;;  %v129_v14 = vrot.slane %v104_v7, 7  ;;  %v130_v15 = vrot.slane %v3668_v52, 7 }
  0x1a   :  { %v3216_v17 = vld [vmem:[%s4924_s1 + $0x84] ss:$8 sps:$4 sm:$0xff]   ;;  %v3218_v21 = vld [vmem:[%s4924_s1 + $0x80] ss:$8 sps:$4 sm:$0xff]   ;;  %v3223_v24 = vld [vmem:[%s4924_s1 + $0x274] ss:$8 sps:$4 sm:$0xff]  }
  0x1b   :  { %366 = vmatpush1.bf16.msra.mxu0 %v3164_v28  ;;  %v109_v2 = vld [vmem:[#allocation2 + $0x28] sm:$0x7f]  ;;  %v2648_v18 = vld [vmem:[%s4924_s1 + $0x180] sm:$0xff]  ;;  %v131_v22 = vsel %vm128_vm1, %v129_v14, %v130_v15  ;;  %v3221_v27 = vld [vmem:[%s4924_s1 + $0x270] ss:$8 sps:$4 sm:$0xff]  }
  0x1c   :  { %367 = vmatprep.subr.bf16.mxu0 %v3168_v29  ;;  %639 = vmatpush1.bf16.msra.mxu1 %v3167_v30  ;;  %v137_v6 = vrot.slane %v109_v2, 7  ;;  %v108_v8 = vld [vmem:[#allocation2 + $0x20] sm:$0x7f]  ;;  %v2649_v19 = vld [vmem:[%s4924_s1 + $0x188] sm:$0xff]  ;;  %v3746_v29 = vld [vmem:[%s4925_s0 + $0x38] sm:$0xff] }
  0x1d   :  { %640 = vmatprep.subr.bf16.mxu1 %v3171_v31  ;;  %v135_v16 = vrot.slane %v108_v8, 7  ;;  %v3219_v20 = vld [vmem:[%s4924_s1 + $0x184] ss:$8 sps:$4 sm:$0xff]   ;;  %v2680_v25 = vcombine.low %v2648_v18, %v2649_v19  ;;  %102 = vst [vmem:[#allocation2 + $0x68] sm:$0xff] %v3746_v29  ;;  %v3227_v49 = vld [vmem:[%s4924_s1 + $0x250] ss:$8 sps:$4 sm:$0xff]  }
  0x1e   :  { %v138_v10 = vsel %vm128_vm1, %v133_v60, %v137_v6  ;;  %v92_v28 = vld [vmem:[%s4925_s0 + $0x28] sm:$0xff]  ;;  %v91_v31 = vld [vmem:[%s4925_s0 + $0x20] sm:$0xff]  ;;  %v3241_v7 = vld [vmem:[%s4924_s1 + $0x214] ss:$8 sps:$4 sm:$0xff]  }
  0x1f   :  { %368 = vmatpush1.bf16.msra.mxu0 %v3170_v32  ;;  %v158_v12 = vpack.c.bf16 %v138_v10, %v134_v5  ;;  %v136_v23 = vsel %vm128_vm1, %v130_v15, %v135_v16  ;;  %v3226_v30 = vld [vmem:[%s4924_s1 + $0x264] ss:$8 sps:$4 sm:$0xff]   ;;  %100 = vst [vmem:[#allocation2 + $0x58] sm:$0xff] %v92_v28  ;;  %v3758_v32 = vld [vmem:[%s4925_s0 + $0x30] sm:$0xff]  ;;  %99 = vst [vmem:[#allocation2 + $0x50] sm:$0xff] %v91_v31 }
  0x20   :  { %369 = vmatprep.subr.bf16.mxu0 %v3174_v33  ;;  %641 = vmatpush1.bf16.msra.mxu1 %v3173_v34  ;;  %v157_v26 = vpack.c.bf16 %v136_v23, %v131_v22  ;;  %v429_v33 = vpack.c.bf16 %v3673_v53, %v3668_v52  ;;  %v111_v34 = vld [vmem:[#allocation2 + $0x48] sm:$0x80]  ;;  %101 = vst [vmem:[#allocation2 + $0x60] sm:$0xff] %v3758_v32  ;;  %v3236_v6 = vld [vmem:[%s4924_s1 + $0x220] ss:$8 sps:$4 sm:$0xff]  }
  0x21   :  { %642 = vmatprep.subr.bf16.mxu1 %v3177_v35  ;;  %385 = vmatprep.mubr.bf16.mxu0 %v158_v12  ;;  %v110_v35 = vld [vmem:[#allocation2 + $0x40] sm:$0x80]  ;;  %v431_v60 = vpack.c.bf16 %v3758_v32, %v91_v31  ;;  %v3239_v8 = vld [vmem:[%s4924_s1 + $0x210] ss:$8 sps:$4 sm:$0xff]   ;;  %v3242_v10 = vld [vmem:[%s4924_s1 + $0x200] ss:$8 sps:$4 sm:$0xff]  }
  0x22   :  { %v3238_v5 = vld [vmem:[%s4924_s1 + $0x224] ss:$8 sps:$4 sm:$0xff]   ;;  %v3245_v12 = vld [vmem:[%s4924_s1 + $0x2f0] ss:$8 sps:$4 sm:$0xff]   ;;  %v3248_v14 = vld [vmem:[%s4924_s1 + $0x2e0] ss:$8 sps:$4 sm:$0xff]  }
  0x23   :  { %370 = vmatpush2.bf16.msra.mxu0 %v3176_v36  ;;  %v432_v36 = vpack.c.bf16 %v3746_v29, %v92_v28  ;;  %v3253_v15 = vld [vmem:[%s4924_s1 + $0x2d4] ss:$8 sps:$4 sm:$0xff]   ;;  %v3251_v16 = vld [vmem:[%s4924_s1 + $0x2d0] ss:$8 sps:$4 sm:$0xff]   ;;  %v3254_v18 = vld [vmem:[%s4924_s1 + $0x2c0] ss:$8 sps:$4 sm:$0xff]  }
  0x24   :  { %371 = vmatprep.subr.bf16.mxu0 %v3180_v37  ;;  %643 = vmatpush2.bf16.msra.mxu1 %v3179_v38  ;;  %v3224_v37 = vld [vmem:[%s4924_s1 + $0x260] ss:$8 sps:$4 sm:$0xff]   ;;  %v716_v38 = vrot.slane %v3659_v50, 1  ;;  %v3259_v19 = vld [vmem:[%s4924_s1 + $0x2b4] ss:$8 sps:$4 sm:$0xff]  }
  0x25   :  { %644 = vmatprep.subr.bf16.mxu1 %v3183_v39  ;;  %v3229_v39 = vld [vmem:[%s4924_s1 + $0x254] ss:$8 sps:$4 sm:$0xff]   ;;  %v3260_v22 = vld [vmem:[%s4924_s1 + $0x2a0] ss:$8 sps:$4 sm:$0xff]  }
  0x26   :  { %v3265_v23 = vld [vmem:[%s4924_s1 + $0x294] ss:$8 sps:$4 sm:$0xff]  }
  0x27   :  { %372 = vmatpush2.bf16.msra.mxu0 %v3182_v40  ;;  %v142_v40 = vrot.slane %v111_v34, 7  ;;  %v114_v52 = vld [vmem:[#allocation2 + $0x60] sm:$0x7f] }
  0x28   :  { %373 = vmatprep.subr.bf16.mxu0 %v3186_v41  ;;  %645 = vmatpush2.bf16.msra.mxu1 %v3185_v42  ;;  %v143_v41 = vrot.slane %v92_v28, 7  ;;  %v139_v42 = vrot.slane %v110_v35, 7  ;;  %v3263_v28 = vld [vmem:[%s4924_s1 + $0x290] ss:$8 sps:$4 sm:$0xff]   ;;  %v3268_v34 = vld [vmem:[%s4924_s1 + $0x284] ss:$8 sps:$4 sm:$0xff]  }
  0x29   :  { %646 = vmatprep.subr.bf16.mxu1 %v3189_v43  ;;  %v140_v43 = vrot.slane %v91_v31, 7  ;;  %v713_v31 = vrot.slane %v3673_v53, 1 }
  0x2a   :  { %v144_v50 = vsel %vm128_vm1, %v142_v40, %v143_v41 }
  0x2b   :  { %374 = vmatpush2.bf16.msra.mxu0 %v3188_v44  ;;  %v688_v44 = vld [vmem:[#allocation2 + $0x18] sm:$0xfe] }
  0x2c   :  { %375 = vmatprep.subr.bf16.mxu0 %v3192_v45  ;;  %647 = vmatpush2.bf16.msra.mxu1 %v3191_v46  ;;  %v692_v45 = vld [vmem:[#allocation2 + $0x38] sm:$0x1]  ;;  %v715_v46 = vrot.slane %v688_v44, 1 }
  0x2d   :  { %648 = vmatprep.subr.bf16.mxu1 %v3195_v48  ;;  %v115_v48 = vld [vmem:[#allocation2 + $0x68] sm:$0x7f] }
  0x2e   :  { %v717_v54 = vsel %vm711_vm2, %v715_v46, %v716_v38  ;;  %v723_v46 = vrot.slane %v3758_v32, 1  ;;  %v3877_v32 = vld [vmem:[%s4926_s10 + $0x78] sm:$0xff] }
  0x2f   :  { %376 = vmatpush2.bf16.msra.mxu0 %v3194_v47  ;;  %v720_v47 = vrot.slane %v692_v45, 1 }
  0x30   :  { %377 = vmatprep.subr.bf16.mxu0 %v3198_v51  ;;  %649 = vmatpush2.bf16.msra.mxu1 %v3197_v56  ;;  %v147_v51 = vrot.slane %v115_v48, 7  ;;  %v3232_v56 = vld [vmem:[%s4924_s1 + $0x244] ss:$8 sps:$4 sm:$0xff]  }
  0x31   :  { %650 = vmatprep.subr.bf16.mxu1 %v3201_v57  ;;  %v721_v55 = vsel %vm711_vm2, %v716_v38, %v720_v47  ;;  %v141_v57 = vsel %vm128_vm1, %v139_v42, %v140_v43  ;;  %v3266_v38 = vld [vmem:[%s4924_s1 + $0x280] ss:$8 sps:$4 sm:$0xff]   ;;  %v693_v42 = vld [vmem:[#allocation2 + $0x50] sm:$0xfe] }
  0x32   :  { %v148_v59 = vsel %vm128_vm1, %v143_v41, %v147_v51  ;;  %v722_v45 = vrot.slane %v693_v42, 1  ;;  %v3871_v51 = vld [vmem:[%s4926_s10 + $0xf8] sm:$0xff] }
  0x33   :  { %378 = vmatpush2.bf16.msra.mxu0 %v3200_v58  ;;  %v145_v58 = vrot.slane %v114_v52, 7  ;;  %4944 = vst [vmem:[#allocation4_spill] sm:$0xff] %v3871_v51  ;;  %v3883_v52 = vld [vmem:[%s4926_s10 + $0xf0] sm:$0xff] }
  0x34   :  { %379 = vmatprep.subr.bf16.mxu0 %v3204_v61  ;;  %651 = vmatpush2.bf16.msra.mxu1 %v3203_v62  ;;  %v160_v61 = vpack.c.bf16 %v148_v59, %v144_v50  ;;  %v724_v48 = vsel %vm711_vm2, %v722_v45, %v723_v46  ;;  %v3919_v59 = vld [vmem:[%s4926_s10 + $0xd8] sm:$0xff] }
  0x35   :  { %652 = vmatprep.subr.bf16.mxu1 %v3207_v1  ;;  %v146_v62 = vsel %vm128_vm1, %v140_v43, %v145_v58  ;;  %v3230_v1 = vld [vmem:[%s4924_s1 + $0x240] ss:$8 sps:$4 sm:$0xff]   ;;  %v697_v43 = vld [vmem:[#allocation2 + $0x70] sm:$0x1] }
  0x36   :  { %v159_v2 = vpack.c.bf16 %v146_v62, %v141_v57  ;;  %v728_v47 = vrot.slane %v697_v43, 1  ;;  %v3907_v57 = vld [vmem:[%s4926_s10 + $0xe0] sm:$0xff]  ;;  %v3937_v62 = vld [vmem:[%s4926_s10 + $0x50] sm:$0xff] }
  0x37   :  { %380 = vmatpush2.bf16.msra.mxu0 %v3206_v63  ;;  %v741_v63 = vpack.c.bf16 %v721_v55, %v717_v54  ;;  %v3889_v54 = vld [vmem:[%s4926_s10 + $0x70] sm:$0xff]  ;;  %v3895_v55 = vld [vmem:[%s4926_s10 + $0xe8] sm:$0xff]  ;;  %v3913_v58 = vld [vmem:[%s4926_s10 + $0x60] sm:$0xff] }
  0x38   :  { %381 = vmatprep.subr.bf16.mxu0 %v3210_v4  ;;  %653 = vmatpush2.bf16.msra.mxu1 %v3209_v3  ;;  %v3235_v3 = vld [vmem:[%s4924_s1 + $0x234] ss:$8 sps:$4 sm:$0xff]   ;;  %v3233_v4 = vld [vmem:[%s4924_s1 + $0x230] ss:$8 sps:$4 sm:$0xff]  }
  0x39   :  { %654 = vmatprep.subr.bf16.mxu1 %v3213_v11  ;;  %v3247_v11 = vld [vmem:[%s4924_s1 + $0x2f4] ss:$8 sps:$4 sm:$0xff]  }
  0x3b   :  { %382 = vmatpush2.bf16.msra.mxu0 %v3212_v9  ;;  %v3244_v9 = vld [vmem:[%s4924_s1 + $0x204] ss:$8 sps:$4 sm:$0xff]  }
  0x3c   :  { %383 = vmatprep.subr.bf16.mxu0 %v3216_v17  ;;  %655 = vmatpush2.bf16.msra.mxu1 %v3215_v13  ;;  %v3250_v13 = vld [vmem:[%s4924_s1 + $0x2e4] ss:$8 sps:$4 sm:$0xff]  }
  0x3d   :  { %656 = vmatprep.subr.bf16.mxu1 %v3219_v20  ;;  %v3256_v17 = vld [vmem:[%s4924_s1 + $0x2c4] ss:$8 sps:$4 sm:$0xff]   ;;  %v3257_v20 = vld [vmem:[%s4924_s1 + $0x2b0] ss:$8 sps:$4 sm:$0xff]  }
  0x3f   :  { %384 = vmatpush2.bf16.msra.mxu0 %v3218_v21  ;;  %v3262_v21 = vld [vmem:[%s4924_s1 + $0x2a4] ss:$8 sps:$4 sm:$0xff]  }
  0x40   :  { %937 = vmatprep.subr.bf16.mxu0 %v3223_v24  ;;  %657 = vmatpush2.bf16.msra.mxu1 %v2680_v25  ;;  %v687_v24 = vld [vmem:[#allocation2 + $0x10] sm:$0xfe]  ;;  %v691_v25 = vld [vmem:[#allocation2 + $0x30] sm:$0x1] }
  0x41   :  { %2986 = vmatprep.subr.mxu1 %v3871_v51 }
  0x42   :  { %386 = vmatmul.mubr.bf16.vlgmr.msra.gmra.mxu0 %v157_v26  ;;  %v694_v26 = vld [vmem:[#allocation2 + $0x58] sm:$0xfe] }
  0x43   :  { %938 = vmatpush1.bf16.msra.mxu0 %v3221_v27  ;;  %659 = vmatmul.mubr.bf16.vlgmr.msra.gmra.mxu1 %v429_v33  ;;  %v698_v27 = vld [vmem:[#allocation2 + $0x78] sm:$0x1]  ;;  %v718_v33 = vrot.slane %v691_v25, 1  ;;  %v725_v35 = vrot.slane %v694_v26, 1 }
  0x44   :  { %939 = vmatprep.subr.bf16.mxu0 %v3226_v30  ;;  %668 = vmatprep.mubr.bf16.mxu1 %v432_v36  ;;  %v712_v30 = vrot.slane %v687_v24, 1  ;;  %v726_v36 = vrot.slane %v3746_v29, 1 }
  0x45   :  { %395 = vmatprep.mubr.bf16.mxu0 %v160_v61  ;;  %v719_v40 = vsel %vm711_vm2, %v713_v31, %v718_v33  ;;  %2987 = vmatpush3.msra.mxu1 %v3877_v32  ;;  %v3931_v61 = vld [vmem:[%s4926_s10 + $0xd0] sm:$0xff]  ;;  %v103_v33 = vld [vmem:[%s4927_s2] sm:$0x3] }
  0x46   :  { %v727_v53 = vsel %vm711_vm2, %v725_v35, %v726_v36  ;;  %2988 = vmatprep.subr.mxu1 %v3883_v52 }
  0x47   :  { %940 = vmatpush1.bf16.msra.mxu0 %v3224_v37  ;;  %v730_v37 = vrot.slane %v698_v27, 1  ;;  %2989 = vmatpush3.msra.mxu1 %v3889_v54  ;;  %v4063_v27 = vshrl.u32 %v71_v0, 7 }
  0x48   :  { %941 = vmatprep.subr.bf16.mxu0 %v3229_v39  ;;  %v714_v39 = vsel %vm711_vm2, %v712_v30, %v713_v31  ;;  %2990 = vmatprep.subr.mxu1 %v3895_v55 }
  0x49   :  { %v731_v41 = vsel %vm711_vm2, %v726_v36, %v730_v37  ;;  %v740_v44 = vpack.c.bf16 %v719_v40, %v714_v39  ;;  %4946 = vst [vmem:[#allocation6_spill] sm:$0xff] %v4063_v27  ;;  %v4066_v31 = vsub.s32 0, %v4063_v27 }
  0x4a   :  { %396 = vmatmul.mubr.bf16.gmra.mxu0 %v159_v2  ;;  %v743_v29 = vpack.c.bf16 %v731_v41, %v727_v53  ;;  %v3954_v2 = vld [vmem:[%s4926_s10 + $0xc0] sm:$0xff] }
  0x4b   :  { %942 = vmatpush1.bf16.msra.mxu0 %v3227_v49  ;;  %669 = vmatmul.mubr.bf16.gmra.mxu1 %v431_v60  ;;  %v729_v49 = vsel %vm711_vm2, %v723_v46, %v728_v47  ;;  %v3925_v60 = vld [vmem:[%s4926_s10 + $0x58] sm:$0xff]  ;;  %4947 = vst [vmem:[#allocation7_spill] sm:$0xff] %v4066_v31  ;;  %v410_v37 = vrot.slane %v103_v33, %v4066_v31 }
  0x4c   :  { %943 = vmatprep.subr.bf16.mxu0 %v3232_v56  ;;  %969 = vmatprep.mubr.bf16.mxu0 %v741_v63  ;;  %v742_v50 = vpack.c.bf16 %v729_v49, %v724_v48  ;;  %v3901_v56 = vld [vmem:[%s4926_s10 + $0x68] sm:$0xff] }
  0x4d   :  { %2991 = vmatpush3.msra.mxu1 %v3901_v56  ;;  %v3943_v63 = vld [vmem:[%s4926_s10 + $0xc8] sm:$0xff] }
  0x4e   :  { %2992 = vmatprep.subr.mxu1 %v3907_v57 }
  0x4f   :  { %944 = vmatpush1.bf16.msra.mxu0 %v3230_v1  ;;  %2993 = vmatpush3.msra.mxu1 %v3913_v58  ;;  %v3949_v1 = vld [vmem:[%s4926_s10 + $0x48] sm:$0xff] }
  0x50   :  { %945 = vmatprep.subr.bf16.mxu0 %v3235_v3  ;;  %2994 = vmatprep.subr.mxu1 %v3919_v59  ;;  %v3959_v3 = vld [vmem:[%s4926_s10 + $0x40] sm:$0xff] }
  0x51   :  { %2995 = vmatpush3.msra.mxu1 %v3925_v60 }
  0x52   :  { %2996 = vmatprep.subr.mxu1 %v3931_v61 }
  0x53   :  { %946 = vmatpush1.bf16.msra.mxu0 %v3233_v4  ;;  %2997 = vmatpush3.msra.mxu1 %v3937_v62  ;;  %v3965_v4 = vld [vmem:[%s4926_s10 + $0xb8] sm:$0xff] }
  0x54   :  { %947 = vmatprep.subr.bf16.mxu0 %v3238_v5  ;;  %2998 = vmatprep.subr.mxu1 %v3943_v63  ;;  %v3971_v5 = vld [vmem:[%s4926_s10 + $0x38] sm:$0xff] }
  0x55   :  { %2999 = vmatpush3.msra.mxu1 %v3949_v1 }
  0x56   :  { %3000 = vmatprep.subr.mxu1 %v3954_v2 }
  0x57   :  { %948 = vmatpush1.bf16.msra.mxu0 %v3236_v6  ;;  %3001 = vmatpush3.msra.mxu1 %v3959_v3  ;;  %v3977_v6 = vld [vmem:[%s4926_s10 + $0xb0] sm:$0xff] }
  0x58   :  { %949 = vmatprep.subr.bf16.mxu0 %v3241_v7  ;;  %3002 = vmatprep.subr.mxu1 %v3965_v4  ;;  %v3983_v7 = vld [vmem:[%s4926_s10 + $0x30] sm:$0xff] }
  0x59   :  { %3003 = vmatpush3.msra.mxu1 %v3971_v5 }
  0x5a   :  { %3004 = vmatprep.subr.mxu1 %v3977_v6 }
  0x5b   :  { %950 = vmatpush1.bf16.msra.mxu0 %v3239_v8  ;;  %v3989_v8 = vld [vmem:[%s4926_s10 + $0xa8] sm:$0xff]  ;;  %3005 = vmatpush3.msra.mxu1 %v3983_v7 }
  0x5c   :  { %951 = vmatprep.subr.bf16.mxu0 %v3244_v9  ;;  %v3995_v9 = vld [vmem:[%s4926_s10 + $0x28] sm:$0xff]  ;;  %3006 = vmatprep.subr.mxu1 %v3989_v8 }
  0x5d   :  { %3007 = vmatpush3.msra.mxu1 %v3995_v9 }
  0x5f   :  { %952 = vmatpush1.bf16.msra.mxu0 %v3242_v10  ;;  %v4001_v10 = vld [vmem:[%s4926_s10 + $0xa0] sm:$0xff] }
  0x60   :  { %953 = vmatprep.subr.bf16.mxu0 %v3247_v11  ;;  %v4007_v11 = vld [vmem:[%s4926_s10 + $0x20] sm:$0xff]  ;;  %3008 = vmatprep.subr.mxu1 %v4001_v10 }
  0x61   :  { %3009 = vmatpush3.msra.mxu1 %v4007_v11 }
  0x63   :  { %954 = vmatpush2.bf16.msra.mxu0 %v3245_v12  ;;  %v4013_v12 = vld [vmem:[%s4926_s10 + $0x98] sm:$0xff] }
  0x64   :  { %955 = vmatprep.subr.bf16.mxu0 %v3250_v13  ;;  %v4019_v13 = vld [vmem:[%s4926_s10 + $0x18] sm:$0xff]  ;;  %3010 = vmatprep.subr.mxu1 %v4013_v12 }
  0x65   :  { %3011 = vmatpush3.msra.mxu1 %v4019_v13 }
  0x67   :  { %956 = vmatpush2.bf16.msra.mxu0 %v3248_v14  ;;  %v4025_v14 = vld [vmem:[%s4926_s10 + $0x90] sm:$0xff] }
  0x68   :  { %957 = vmatprep.subr.bf16.mxu0 %v3253_v15  ;;  %v4031_v15 = vld [vmem:[%s4926_s10 + $0x10] sm:$0xff]  ;;  %3012 = vmatprep.subr.mxu1 %v4025_v14 }
  0x69   :  { %3013 = vmatpush3.msra.mxu1 %v4031_v15 }
  0x6b   :  { %958 = vmatpush2.bf16.msra.mxu0 %v3251_v16  ;;  %v4037_v16 = vld [vmem:[%s4926_s10 + $0x88] sm:$0xff] }
  0x6c   :  { %959 = vmatprep.subr.bf16.mxu0 %v3256_v17  ;;  %v4043_v17 = vld [vmem:[%s4926_s10 + $0x8] sm:$0xff]  ;;  %3014 = vmatprep.subr.mxu1 %v4037_v16 }
  0x6d   :  { %3015 = vmatpush3.msra.mxu1 %v4043_v17 }
  0x6f   :  { %960 = vmatpush2.bf16.msra.mxu0 %v3254_v18  ;;  %v4049_v18 = vld [vmem:[%s4926_s10 + $0x80] sm:$0xff] }
  0x70   :  { %961 = vmatprep.subr.bf16.mxu0 %v3259_v19  ;;  %v4055_v19 = vld [vmem:[%s4926_s10] sm:$0xff]  ;;  %3016 = vmatprep.subr.mxu1 %v4049_v18 }
  0x71   :  { %4945 = vst [vmem:[#allocation5_spill] sm:$0xff] %v4055_v19  ;;  %3017 = vmatpush3.msra.mxu1 %v4055_v19 }
  0x72   :  { %3021 = vmatprep.subr.msk.mxu1 %vm1167_vm3, %v3871_v51 }
  0x73   :  { %962 = vmatpush2.bf16.msra.mxu0 %v3257_v20 }
  0x74   :  { %963 = vmatprep.subr.bf16.mxu0 %v3262_v21 }
  0x77   :  { %964 = vmatpush2.bf16.msra.mxu0 %v3260_v22 }
  0x78   :  { %965 = vmatprep.subr.bf16.mxu0 %v3265_v23 }
  0x7b   :  { %966 = vmatpush2.bf16.msra.mxu0 %v3263_v28 }
  0x7c   :  { %967 = vmatprep.subr.bf16.mxu0 %v3268_v34  ;;  %v4072_v34 = vsub.s32 1, %v4063_v27 }
  0x7e   :  { %4948 = vst [vmem:[#allocation8_spill] sm:$0xff] %v4072_v34  ;;  %v414_v0 = vrot.slane %v103_v33, %v4072_v34 }
  0x7f   :  { %968 = vmatpush2.bf16.msra.mxu0 %v3266_v38 }
  0x82   :  { %970 = vmatmul.mubr.bf16.vlgmr.msra.gmra.mxu0 %v740_v44 }
  0x83   :  { %979 = vmatprep.mubr.bf16.mxu0 %v743_v29 }
  0x8a   :  { %980 = vmatmul.mubr.bf16.gmra.mxu0 %v742_v50 }
 0x102   :  { %v387_v20 = vpop.f32.mrf.mxu0 }
 0x103   :  { %v660_v23 = vpop.f32.mrf.mxu1  ;;  %v417_v41 = vadd.f32 %v410_v37, %v387_v20 }
 0x104   :  { %v389_v21 = vpop.f32.mrf.mxu0 }
 0x105   :  { %v662_v26 = vpop.f32.mrf.mxu1  ;;  %v418_v44 = vadd.f32 %v414_v0, %v389_v21  ;;  %v679_v48 = vadd.f32 %v660_v23, %v417_v41 }
 0x106   :  { %v391_v22 = vpop.f32.mrf.mxu0 }
 0x107   :  { %v664_v30 = vpop.f32.mrf.mxu1  ;;  %v419_v40 = vadd.f32 %v410_v37, %v391_v22  ;;  %v680_v31 = vadd.f32 %v662_v26, %v418_v44 }
 0x108   :  { %v393_v24 = vpop.f32.mrf.mxu0 }
 0x109   :  { %v666_v36 = vpop.f32.mrf.mxu1  ;;  %v420_v42 = vadd.f32 %v414_v0, %v393_v24  ;;  %v681_v45 = vadd.f32 %v664_v30, %v419_v40 }
 0x10a   :  { %v397_v25 = vpop.f32.mrf.mxu0 }
 0x10b   :  { %v670_v38 = vpop.f32.mrf.mxu1  ;;  %v421_v46 = vadd.f32 %v410_v37, %v397_v25  ;;  %v682_v49 = vadd.f32 %v666_v36, %v420_v42 }
 0x10c   :  { %v399_v28 = vpop.f32.mrf.mxu0 }
 0x10d   :  { %v672_v43 = vpop.f32.mrf.mxu1  ;;  %v422_v50 = vadd.f32 %v414_v0, %v399_v28  ;;  %v683_v34 = vadd.f32 %v670_v38, %v421_v46 }
 0x10e   :  { %v401_v35 = vpop.f32.mrf.mxu0 }
 0x10f   :  { %v674_v51 = vpop.f32.mrf.mxu1  ;;  %v423_v19 = vadd.f32 %v410_v37, %v401_v35  ;;  %v684_v25 = vadd.f32 %v672_v43, %v422_v50 }
 0x110   :  { %v403_v39 = vpop.f32.mrf.mxu0 }
 0x111   :  { %v424_v24 = vadd.f32 %v414_v0, %v403_v39  ;;  %v676_v40 = vpop.f32.mrf.mxu1  ;;  %v685_v36 = vadd.f32 %v674_v51, %v423_v19 }
 0x113   :  { %v686_v0 = vadd.f32 %v676_v40, %v424_v24 }
 0x142   :  { %v971_v53 = vpop.f32.mrf.mxu0 }
 0x143   :  { %v4078_v22 = vadd.f32 %v971_v53, %v679_v48 }
 0x144   :  { %v973_v29 = vpop.f32.mrf.mxu0 }
 0x145   :  { %v4082_v21 = vadd.f32 %v973_v29, %v680_v31  ;;  %v1032_v31 = vmul.f32 %v4078_v22, %v4078_v22 }
 0x146   :  { %v975_v47 = vpop.f32.mrf.mxu0 }
 0x147   :  { %v4076_v27 = vadd.f32 %v975_v47, %v681_v45  ;;  %v1033_v19 = vmul.f32 %v4082_v21, %v4082_v21 }
 0x148   :  { %v977_v33 = vpop.f32.mrf.mxu0 }
 0x149   :  { %v4080_v20 = vadd.f32 %v977_v33, %v682_v49  ;;  %v1034_v28 = vmul.f32 %v4076_v27, %v4076_v27  ;;  %v1014_v38 = vadd.f32 %v4076_v27, %v4078_v22 }
 0x14a   :  { %v981_v30 = vpop.f32.mrf.mxu0 }
 0x14b   :  { %v4084_v23 = vadd.f32 %v981_v30, %v683_v34  ;;  %v1035_v35 = vmul.f32 %v4080_v20, %v4080_v20  ;;  %v1023_v51 = vadd.f32 %v4080_v20, %v4082_v21  ;;  %v1040_v43 = vadd.f32 %v1034_v28, %v1032_v31 }
 0x14c   :  { %v983_v26 = vpop.f32.mrf.mxu0 }
 0x14d   :  { %v4090_v37 = vadd.f32 %v983_v26, %v684_v25  ;;  %v1036_v34 = vmul.f32 %v4084_v23, %v4084_v23  ;;  %v1015_v42 = vadd.f32 %v1014_v38, %v4084_v23  ;;  %v1049_v45 = vadd.f32 %v1035_v35, %v1033_v19 }
 0x14e   :  { %v985_v39 = vpop.f32.mrf.mxu0 }
 0x14f   :  { %v4102_v53 = vadd.f32 %v985_v39, %v685_v36  ;;  %v1037_v41 = vmul.f32 %v4090_v37, %v4090_v37  ;;  %v1024_v29 = vadd.f32 %v1023_v51, %v4090_v37  ;;  %v1041_v49 = vadd.f32 %v1040_v43, %v1036_v34 }
 0x150   :  { %v987_v44 = vpop.f32.mrf.mxu0 }
 0x151   :  { %v4108_v46 = vadd.f32 %v987_v44, %v686_v0  ;;  %v1016_v47 = vadd.f32 %v1015_v42, %v4102_v53  ;;  %v1038_v48 = vmul.f32 %v4102_v53, %v4102_v53  ;;  %v1050_v50 = vadd.f32 %v1049_v45, %v1037_v41 }
 0x153   :  { %4949 = vst [vmem:[#allocation9_spill] sm:$0xff] %v4108_v46  ;;  %v1025_v33 = vadd.f32 %v1024_v29, %v4108_v46  ;;  %v1039_v24 = vmul.f32 %v4108_v46, %v4108_v46  ;;  %v1017_v30 = vrot.slane %v1016_v47, 4  ;;  %v1042_v25 = vadd.f32 %v1041_v49, %v1038_v48 }
 0x155   :  { %v1026_v40 = vrot.slane %v1025_v33, 4  ;;  %v1051_v28 = vadd.f32 %v1050_v50, %v1039_v24  ;;  %v1018_v36 = vadd.f32 %v1017_v30, %v1016_v47  ;;  %v1043_v26 = vrot.slane %v1042_v25, 4 }
 0x157   :  { %v1027_v35 = vadd.f32 %v1026_v40, %v1025_v33  ;;  %v1052_v38 = vrot.slane %v1051_v28, 4  ;;  %v1019_v31 = vrot.slane %v1018_v36, 2  ;;  %v1044_v0 = vadd.f32 %v1043_v26, %v1042_v25 }
 0x159   :  { %v1028_v39 = vrot.slane %v1027_v35, 2  ;;  %v1053_v51 = vadd.f32 %v1052_v38, %v1051_v28  ;;  %v1045_v19 = vrot.slane %v1044_v0, 2  ;;  %v1020_v34 = vadd.f32 %v1019_v31, %v1018_v36  ;;  %v4951_v28 = vld [vmem:[#allocation6_spill] sm:$0xff]  ;;  %v1136_v31 = vld [vmem:[%s4929_s3] sm:$0x1] }
 0x15b   :  { %v1029_v41 = vadd.f32 %v1028_v39, %v1027_v35  ;;  %v1054_v42 = vrot.slane %v1053_v51, 2  ;;  %v1046_v43 = vadd.f32 %v1045_v19, %v1044_v0  ;;  %v1021_v46 = vrot.slane %v1020_v34, 1 }
 0x15d   :  { %v1030_v44 = vrot.slane %v1029_v41, 1  ;;  %v1055_v29 = vadd.f32 %v1054_v42, %v1053_v51  ;;  %v1047_v45 = vrot.slane %v1046_v43, 1  ;;  %v1022_v24 = vadd.f32 %v1021_v46, %v1020_v34  ;;  %v1157_v51 = vld [vmem:[%s4930_s4] sm:$0x1] }
 0x15e   :  { %v3450_v46 = vmov 1966171168  }
 0x15f   :  { %v1056_v48 = vrot.slane %v1055_v29, 1  ;;  %v1048_v49 = vadd.f32 %v1047_v45, %v1046_v43  ;;  %v1031_v50 = vadd.f32 %v1030_v44, %v1029_v41  ;;  %v1141_v25 = vunpack.c.l.s4 %v3450_v46  ;;  %v4952_v41 = vld [vmem:[#allocation7_spill] sm:$0xff]  ;;  %v3275_v45 = vld [vmem:[%s4928_s6 + $0x160] ss:$8 sps:$4 sm:$0xff]  }
 0x160   :  { %v3269_v43 = vld [vmem:[%s4928_s6 + $0x170] ss:$8 sps:$4 sm:$0xff]   ;;  %v4953_v46 = vld [vmem:[#allocation4_spill] sm:$0xff] }
 0x161   :  { %v1057_v47 = vadd.f32 %v1056_v48, %v1055_v29  ;;  %v1058_v30 = vsel %vm128_vm1, %v1022_v24, %v1048_v49  ;;  %v1142_v40 = vunpack.c.0.s8 %v1141_v25  ;;  %v3277_v29 = vld [vmem:[%s4928_s6 + $0x164] ss:$8 sps:$4 sm:$0xff]   ;;  %v3283_v48 = vld [vmem:[%s4928_s6 + $0x154] ss:$8 sps:$4 sm:$0xff]   ;;  %v3281_v49 = vld [vmem:[%s4928_s6 + $0x150] ss:$8 sps:$4 sm:$0xff]  }
 0x162   :  { %v3295_v24 = vld [vmem:[%s4928_s6 + $0x134] ss:$8 sps:$4 sm:$0xff]   ;;  %v3356_v25 = vld [vmem:[%s4928_s6 + $0x90] ss:$8 sps:$4 sm:$0xff]  }
 0x163   :  { %v1059_v33 = vsel %vm128_vm1, %v1031_v50, %v1057_v47  ;;  %v4244_v36 = vsub.s32 %v1142_v40, %v4951_v28  ;;  %v3289_v50 = vld [vmem:[%s4928_s6 + $0x144] ss:$8 sps:$4 sm:$0xff]   ;;  %v3287_v47 = vld [vmem:[%s4928_s6 + $0x140] ss:$8 sps:$4 sm:$0xff]  }
 0x164   :  { %1124 = vmatprep.mubr.f32.mxu1 %v1059_v33  ;;  %v3293_v33 = vld [vmem:[%s4928_s6 + $0x130] ss:$8 sps:$4 sm:$0xff]   ;;  %v3364_v40 = vld [vmem:[%s4928_s6 + $0x84] ss:$8 sps:$4 sm:$0xff]   ;;  %v3362_v28 = vld [vmem:[%s4928_s6 + $0x80] ss:$8 sps:$4 sm:$0xff]  }
 0x165   :  { %1125 = vmatmul.mubr.f32.vlgmr.msra.gmra.mxu1 %v1058_v30  ;;  %v3301_v30 = vld [vmem:[%s4928_s6 + $0x124] ss:$8 sps:$4 sm:$0xff]  }
 0x166   :  { %3022 = vmatpush3.xpose.msk.msra.mxu1 %vm1167_vm3, %v3877_v32  ;;  %v4950_v32 = vld [vmem:[#allocation5_spill] sm:$0xff] }
 0x167   :  { %3023 = vmatprep.subr.msk.mxu1 %vm1167_vm3, %v3883_v52  ;;  %v3271_v52 = vld [vmem:[%s4928_s6 + $0x174] ss:$8 sps:$4 sm:$0xff]  }
 0x16a   :  { %3024 = vmatpush3.xpose.msk.msra.mxu1 %vm1167_vm3, %v3889_v54  ;;  %v3272_v54 = vld [vmem:[%s4928_s6 + $0x70] ss:$8 sps:$4 sm:$0xff]  }
 0x16b   :  { %3025 = vmatprep.subr.msk.mxu1 %vm1167_vm3, %v3895_v55  ;;  %v3274_v55 = vld [vmem:[%s4928_s6 + $0x74] ss:$8 sps:$4 sm:$0xff]  }
 0x16c   :  { %1653 = vmatprep.subr.bf16.mxu0 %v3274_v55  ;;  %v3313_v55 = vld [vmem:[%s4928_s6 + $0x104] ss:$8 sps:$4 sm:$0xff]  }
 0x16d   :  { %1654 = vmatpush1.bf16.msra.mxu0 %v3272_v54  ;;  %v3305_v54 = vld [vmem:[%s4928_s6 + $0x110] ss:$8 sps:$4 sm:$0xff]  }
 0x16e   :  { %3026 = vmatpush3.xpose.msk.msra.mxu1 %vm1167_vm3, %v3901_v56  ;;  %v3278_v56 = vld [vmem:[%s4928_s6 + $0x60] ss:$8 sps:$4 sm:$0xff]  }
 0x16f   :  { %3027 = vmatprep.subr.msk.mxu1 %vm1167_vm3, %v3907_v57  ;;  %v3280_v57 = vld [vmem:[%s4928_s6 + $0x64] ss:$8 sps:$4 sm:$0xff]  }
 0x170   :  { %1655 = vmatprep.subr.bf16.mxu0 %v3280_v57  ;;  %v3319_v57 = vld [vmem:[%s4928_s6 + $0x1f4] ss:$8 sps:$4 sm:$0xff]  }
 0x171   :  { %1656 = vmatpush1.bf16.msra.mxu0 %v3278_v56  ;;  %v3311_v56 = vld [vmem:[%s4928_s6 + $0x100] ss:$8 sps:$4 sm:$0xff]  }
 0x172   :  { %3028 = vmatpush3.xpose.msk.msra.mxu1 %vm1167_vm3, %v3913_v58  ;;  %v3286_v58 = vld [vmem:[%s4928_s6 + $0x54] ss:$8 sps:$4 sm:$0xff]  }
 0x173   :  { %3029 = vmatprep.subr.msk.mxu1 %vm1167_vm3, %v3919_v59  ;;  %v3284_v59 = vld [vmem:[%s4928_s6 + $0x50] ss:$8 sps:$4 sm:$0xff]   ;;  %1657 = vmatprep.subr.bf16.mxu0 %v3286_v58 }
 0x174   :  { %v3317_v58 = vld [vmem:[%s4928_s6 + $0x1f0] ss:$8 sps:$4 sm:$0xff]  }
 0x175   :  { %1658 = vmatpush1.bf16.msra.mxu0 %v3284_v59  ;;  %v3325_v59 = vld [vmem:[%s4928_s6 + $0x1e4] ss:$8 sps:$4 sm:$0xff]  }
 0x176   :  { %3030 = vmatpush3.xpose.msk.msra.mxu1 %vm1167_vm3, %v3925_v60  ;;  %v3292_v60 = vld [vmem:[%s4928_s6 + $0x44] ss:$8 sps:$4 sm:$0xff]  }
 0x177   :  { %3031 = vmatprep.subr.msk.mxu1 %vm1167_vm3, %v3931_v61  ;;  %v3290_v61 = vld [vmem:[%s4928_s6 + $0x40] ss:$8 sps:$4 sm:$0xff]   ;;  %1659 = vmatprep.subr.bf16.mxu0 %v3292_v60 }
 0x178   :  { %v3323_v60 = vld [vmem:[%s4928_s6 + $0x1e0] ss:$8 sps:$4 sm:$0xff]  }
 0x179   :  { %1660 = vmatpush1.bf16.msra.mxu0 %v3290_v61  ;;  %v3331_v61 = vld [vmem:[%s4928_s6 + $0x1d4] ss:$8 sps:$4 sm:$0xff]  }
 0x17a   :  { %3032 = vmatpush3.xpose.msk.msra.mxu1 %vm1167_vm3, %v3937_v62  ;;  %v3298_v62 = vld [vmem:[%s4928_s6 + $0x34] ss:$8 sps:$4 sm:$0xff]  }
 0x17b   :  { %3033 = vmatprep.subr.msk.mxu1 %vm1167_vm3, %v3943_v63  ;;  %v3296_v63 = vld [vmem:[%s4928_s6 + $0x30] ss:$8 sps:$4 sm:$0xff]   ;;  %1661 = vmatprep.subr.bf16.mxu0 %v3298_v62 }
 0x17c   :  { %v3329_v62 = vld [vmem:[%s4928_s6 + $0x1d0] ss:$8 sps:$4 sm:$0xff]  }
 0x17d   :  { %1662 = vmatpush1.bf16.msra.mxu0 %v3296_v63  ;;  %v3337_v63 = vld [vmem:[%s4928_s6 + $0x1c4] ss:$8 sps:$4 sm:$0xff]  }
 0x17e   :  { %3034 = vmatpush3.xpose.msk.msra.mxu1 %vm1167_vm3, %v3949_v1  ;;  %v3304_v1 = vld [vmem:[%s4928_s6 + $0x24] ss:$8 sps:$4 sm:$0xff]  }
 0x17f   :  { %3035 = vmatprep.subr.msk.mxu1 %vm1167_vm3, %v3954_v2  ;;  %v3302_v2 = vld [vmem:[%s4928_s6 + $0x20] ss:$8 sps:$4 sm:$0xff]   ;;  %1663 = vmatprep.subr.bf16.mxu0 %v3304_v1 }
 0x180   :  { %v3335_v1 = vld [vmem:[%s4928_s6 + $0x1c0] ss:$8 sps:$4 sm:$0xff]  }
 0x181   :  { %1664 = vmatpush1.bf16.msra.mxu0 %v3302_v2  ;;  %v3334_v2 = vld [vmem:[%s4928_s6 + $0xd4] ss:$8 sps:$4 sm:$0xff]  }
 0x182   :  { %3036 = vmatpush3.xpose.msk.msra.mxu1 %vm1167_vm3, %v3959_v3  ;;  %v3310_v3 = vld [vmem:[%s4928_s6 + $0x14] ss:$8 sps:$4 sm:$0xff]  }
 0x183   :  { %3037 = vmatprep.subr.msk.mxu1 %vm1167_vm3, %v3965_v4  ;;  %v3308_v4 = vld [vmem:[%s4928_s6 + $0x10] ss:$8 sps:$4 sm:$0xff]   ;;  %1665 = vmatprep.subr.bf16.mxu0 %v3310_v3  ;;  %v3343_v3 = vld [vmem:[%s4928_s6 + $0x1b4] ss:$8 sps:$4 sm:$0xff]  }
 0x185   :  { %1666 = vmatpush1.bf16.msra.mxu0 %v3308_v4  ;;  %v3332_v4 = vld [vmem:[%s4928_s6 + $0xd0] ss:$8 sps:$4 sm:$0xff]  }
 0x186   :  { %3038 = vmatpush3.xpose.msk.msra.mxu1 %vm1167_vm3, %v3971_v5  ;;  %v3316_v5 = vld [vmem:[%s4928_s6 + $0x4] ss:$8 sps:$4 sm:$0xff]  }
 0x187   :  { %3039 = vmatprep.subr.msk.mxu1 %vm1167_vm3, %v3977_v6  ;;  %v3314_v6 = vld [vmem:[%s4928_s6] ss:$8 sps:$4 sm:$0xff]   ;;  %1667 = vmatprep.subr.bf16.mxu0 %v3316_v5  ;;  %v3341_v5 = vld [vmem:[%s4928_s6 + $0x1b0] ss:$8 sps:$4 sm:$0xff]  }
 0x189   :  { %1668 = vmatpush1.bf16.msra.mxu0 %v3314_v6  ;;  %v3349_v6 = vld [vmem:[%s4928_s6 + $0x1a4] ss:$8 sps:$4 sm:$0xff]  }
 0x18a   :  { %3040 = vmatpush3.xpose.msk.msra.mxu1 %vm1167_vm3, %v3983_v7  ;;  %v3322_v7 = vld [vmem:[%s4928_s6 + $0xf4] ss:$8 sps:$4 sm:$0xff]  }
 0x18b   :  { %3041 = vmatprep.subr.msk.mxu1 %vm1167_vm3, %v3989_v8  ;;  %v3320_v8 = vld [vmem:[%s4928_s6 + $0xf0] ss:$8 sps:$4 sm:$0xff]   ;;  %1669 = vmatprep.subr.bf16.mxu0 %v3322_v7  ;;  %v3347_v7 = vld [vmem:[%s4928_s6 + $0x1a0] ss:$8 sps:$4 sm:$0xff]  }
 0x18d   :  { %1670 = vmatpush2.bf16.msra.mxu0 %v3320_v8  ;;  %v3340_v8 = vld [vmem:[%s4928_s6 + $0xc4] ss:$8 sps:$4 sm:$0xff]  }
 0x18e   :  { %3042 = vmatpush3.xpose.msk.msra.mxu1 %vm1167_vm3, %v3995_v9  ;;  %v3328_v9 = vld [vmem:[%s4928_s6 + $0xe4] ss:$8 sps:$4 sm:$0xff]  }
 0x18f   :  { %3043 = vmatprep.subr.msk.mxu1 %vm1167_vm3, %v4001_v10  ;;  %v3326_v10 = vld [vmem:[%s4928_s6 + $0xe0] ss:$8 sps:$4 sm:$0xff]   ;;  %1671 = vmatprep.subr.bf16.mxu0 %v3328_v9 }
 0x190   :  { %v3338_v9 = vld [vmem:[%s4928_s6 + $0xc0] ss:$8 sps:$4 sm:$0xff]  }
 0x191   :  { %1672 = vmatpush2.bf16.msra.mxu0 %v3326_v10  ;;  %v3355_v10 = vld [vmem:[%s4928_s6 + $0x194] ss:$8 sps:$4 sm:$0xff]  }
 0x192   :  { %3044 = vmatpush3.xpose.msk.msra.mxu1 %vm1167_vm3, %v4007_v11  ;;  %1673 = vmatprep.subr.bf16.mxu0 %v3334_v2 }
 0x193   :  { %3045 = vmatprep.subr.msk.mxu1 %vm1167_vm3, %v4013_v12 }
 0x195   :  { %1674 = vmatpush2.bf16.msra.mxu0 %v3332_v4 }
 0x196   :  { %3046 = vmatpush3.xpose.msk.msra.mxu1 %vm1167_vm3, %v4019_v13  ;;  %1675 = vmatprep.subr.bf16.mxu0 %v3340_v8  ;;  %v1405_v8 = vld [vmem:[#allocation2] sm:$0x80] }
 0x197   :  { %3047 = vmatprep.subr.msk.mxu1 %vm1167_vm3, %v4025_v14 }
 0x199   :  { %1676 = vmatpush2.bf16.msra.mxu0 %v3338_v9  ;;  %v4431_v9 = vld [vmem:[%s4926_s10 + $0x78] sm:$0xff] }
 0x19a   :  { %3048 = vmatpush3.xpose.msk.msra.mxu1 %vm1167_vm3, %v4031_v15 }
 0x19b   :  { %3049 = vmatprep.subr.msk.mxu1 %vm1167_vm3, %v4037_v16 }
 0x19e   :  { %3050 = vmatpush3.xpose.msk.msra.mxu1 %vm1167_vm3, %v4043_v17 }
 0x19f   :  { %3051 = vmatprep.subr.msk.mxu1 %vm1167_vm3, %v4049_v18 }
 0x1a2   :  { %3052 = vmatpush3.xpose.msk.msra.mxu1 %vm1167_vm3, %v4950_v32  ;;  %v3299_v32 = vld [vmem:[%s4928_s6 + $0x120] ss:$8 sps:$4 sm:$0xff]  }
 0x1a3   :  { %1926 = vmatprep.subr.bf16.mxu1 %v3271_v52  ;;  %v3307_v52 = vld [vmem:[%s4928_s6 + $0x114] ss:$8 sps:$4 sm:$0xff]  }
 0x225   :  { %v3018_v11 = vpop.f32.mrf.mxu1 }
 0x227   :  { %v3019_v12 = vpop.f32.mrf.mxu1 }
 0x228   :  { %v3020_v13 = vadd.f32 %v3019_v12, %v3018_v11  ;;  %v3353_v11 = vld [vmem:[%s4928_s6 + $0x190] ss:$8 sps:$4 sm:$0xff]   ;;  %v3346_v12 = vld [vmem:[%s4928_s6 + $0xb4] ss:$8 sps:$4 sm:$0xff]  }
 0x229   :  { %1677 = vmatprep.subr.bf16.mxu0 %v3346_v12  ;;  %v4437_v12 = vld [vmem:[%s4926_s10 + $0xf0] sm:$0xff] }
 0x22a   :  { %v1130_v14 = vmul.f32 0.001953125, %v3020_v13  ;;  %v3344_v13 = vld [vmem:[%s4928_s6 + $0xb0] ss:$8 sps:$4 sm:$0xff]  }
 0x22b   :  { %1678 = vmatpush2.bf16.msra.mxu0 %v3344_v13 }
 0x22c   :  { %v1131_v15 = vmul.f32 %v1130_v14, %v1130_v14 }
 0x22e   :  { %v1133_v16 = vrot.slane %v1131_v15, 7  ;;  %v3359_v15 = vld [vmem:[%s4928_s6 + $0x180] ss:$8 sps:$4 sm:$0xff]  }
 0x230   :  { %v1135_v17 = vsub.f32 %v1130_v14, %v1133_v16  ;;  %v3352_v16 = vld [vmem:[%s4928_s6 + $0xa4] ss:$8 sps:$4 sm:$0xff]  }
 0x231   :  { %1679 = vmatprep.subr.bf16.mxu0 %v3352_v16 }
 0x232   :  { %v1137_v18 = vadd.f32 0.8, %v1135_v17  ;;  %v3350_v17 = vld [vmem:[%s4928_s6 + $0xa0] ss:$8 sps:$4 sm:$0xff]  }
 0x233   :  { %1680 = vmatpush2.bf16.msra.mxu0 %v3350_v17 }
 0x234   :  { %3413 = vrsqrt.f32 %v1137_v18  ;;  %v3358_v18 = vld [vmem:[%s4928_s6 + $0x94] ss:$8 sps:$4 sm:$0xff]  }
 0x235   :  { %1681 = vmatprep.subr.bf16.mxu0 %v3358_v18  ;;  %v1429_v18 = vrot.slane %v1405_v8, 7  ;;  %v4548_v8 = vld [vmem:[%s4926_s10 + $0x40] sm:$0xff] }
 0x237   :  { %1682 = vmatpush2.bf16.msra.mxu0 %v3356_v25  ;;  %v4450_v25 = vld [vmem:[%s4926_s10 + $0xe8] sm:$0xff] }
 0x238   :  { %1683 = vmatprep.subr.bf16.mxu0 %v3364_v40 }
 0x23b   :  { %1684 = vmatpush2.bf16.msra.mxu0 %v3362_v28 }
 0x241   :  { %v3414_v26 = vpop.eup %3413 }
 0x242   :  { %v1146_v35 = vrot.slane %v3414_v26, %v4244_v36  ;;  %v3367_v26 = vld [vmem:[%s4928_s6 + $0x274] ss:$8 sps:$4 sm:$0xff]  }
 0x243   :  { %2236 = vmatprep.subr.bf16.mxu0 %v3367_v26 }
 0x244   :  { %v1147_v38 = vcombine.high %v1146_v35, %v1146_v35 }
 0x246   :  { %v1154_v0 = vrot.slane %v1147_v38, %v4244_v36 }
 0x248   :  { %v1156_v39 = vmul.f32 %v1154_v0, %v1136_v31  ;;  %v4954_v31 = vld [vmem:[#allocation8_spill] sm:$0xff] }
 0x24a   :  { %v1158_v19 = vmul.f32 %v1156_v39, %v1130_v14  ;;  %v3361_v14 = vld [vmem:[%s4928_s6 + $0x184] ss:$8 sps:$4 sm:$0xff]  }
 0x24c   :  { %v1159_v34 = vsub.f32 %v1157_v51, %v1158_v19 }
 0x24e   :  { %v1164_v42 = vrot.slane %v1159_v34, %v4952_v41 }
 0x250   :  { %v1166_v44 = vsel %vm128_vm1, %v1156_v39, %v1164_v42 }
 0x251   :  { %3053 = vmatprep.mubr.msk.f32.mxu1 %vm1167_vm3, %v1166_v44 }
 0x252   :  { %3054 = vmatmul.mubr.msk.f32.vlgmr.msra.gmra.mxu1 %vm1167_vm3, %v1166_v44 }
 0x253   :  { %1927 = vmatpush1.bf16.msra.mxu1 %v3269_v43  ;;  %v1379_v43 = vstv %s4931_s5 }
 0x254   :  { %1928 = vmatprep.subr.bf16.mxu1 %v3277_v29 }
 0x257   :  { %1929 = vmatpush1.bf16.msra.mxu1 %v3275_v45 }
 0x258   :  { %1930 = vmatprep.subr.bf16.mxu1 %v3283_v48 }
 0x25b   :  { %1931 = vmatpush1.bf16.msra.mxu1 %v3281_v49 }
 0x25c   :  { %1932 = vmatprep.subr.bf16.mxu1 %v3289_v50 }
 0x25f   :  { %1933 = vmatpush1.bf16.msra.mxu1 %v3287_v47  ;;  %v4955_v47 = vld [vmem:[#allocation9_spill] sm:$0xff] }
 0x260   :  { %1934 = vmatprep.subr.bf16.mxu1 %v3295_v24 }
 0x263   :  { %1935 = vmatpush1.bf16.msra.mxu1 %v3293_v33 }
 0x264   :  { %1936 = vmatprep.subr.bf16.mxu1 %v3301_v30 }
 0x267   :  { %1937 = vmatpush1.bf16.msra.mxu1 %v3299_v32 }
 0x268   :  { %1938 = vmatprep.subr.bf16.mxu1 %v3307_v52 }
 0x26b   :  { %1939 = vmatpush1.bf16.msra.mxu1 %v3305_v54 }
 0x26c   :  { %1940 = vmatprep.subr.bf16.mxu1 %v3313_v55 }
 0x26f   :  { %1941 = vmatpush1.bf16.msra.mxu1 %v3311_v56 }
 0x270   :  { %1942 = vmatprep.subr.bf16.mxu1 %v3319_v57 }
 0x273   :  { %1943 = vmatpush2.bf16.msra.mxu1 %v3317_v58 }
 0x274   :  { %1944 = vmatprep.subr.bf16.mxu1 %v3325_v59 }
 0x277   :  { %1945 = vmatpush2.bf16.msra.mxu1 %v3323_v60 }
 0x278   :  { %1946 = vmatprep.subr.bf16.mxu1 %v3331_v61 }
 0x27b   :  { %1947 = vmatpush2.bf16.msra.mxu1 %v3329_v62 }
 0x27c   :  { %1948 = vmatprep.subr.bf16.mxu1 %v3337_v63 }
 0x27f   :  { %1949 = vmatpush2.bf16.msra.mxu1 %v3335_v1 }
 0x280   :  { %1950 = vmatprep.subr.bf16.mxu1 %v3343_v3 }
 0x283   :  { %1951 = vmatpush2.bf16.msra.mxu1 %v3341_v5 }
 0x284   :  { %1952 = vmatprep.subr.bf16.mxu1 %v3349_v6  ;;  %v1406_v6 = vld [vmem:[#allocation2 + $0x8] sm:$0x80] }
 0x287   :  { %1953 = vmatpush2.bf16.msra.mxu1 %v3347_v7 }
 0x288   :  { %1954 = vmatprep.subr.bf16.mxu1 %v3355_v10 }
 0x28b   :  { %1955 = vmatpush2.bf16.msra.mxu1 %v3353_v11  ;;  %v1412_v11 = vld [vmem:[#allocation2 + $0x48] sm:$0x80] }
 0x28c   :  { %1956 = vmatprep.subr.bf16.mxu1 %v3361_v14  ;;  %v1432_v14 = vrot.slane %v1406_v6, 7  ;;  %v1442_v26 = vrot.slane %v1412_v11, 7  ;;  %v4554_v11 = vld [vmem:[%s4926_s10 + $0xb8] sm:$0xff] }
 0x28f   :  { %1957 = vmatpush2.bf16.msra.mxu1 %v3359_v15  ;;  %v4443_v15 = vld [vmem:[%s4926_s10 + $0x70] sm:$0xff] }
 0x290   :  { %3055 = vmatprep.subr.mxu1 %v4953_v46 }
 0x312   :  { %v1333_v35 = vpop.f32.mrf.mxu1 }
 0x313   :  { %v1342_v38 = vrot.slane %v1333_v35, %v4952_v41  ;;  %v1358_v0 = vrot.slane %v1333_v35, %v4954_v31 }
 0x314   :  { %v1335_v39 = vpop.f32.mrf.mxu1 }
 0x315   :  { %v1347_v51 = vmul.f32 %v1342_v38, %v4078_v22  ;;  %v1349_v19 = vmul.f32 %v1342_v38, %v4076_v27  ;;  %v1351_v34 = vmul.f32 %v1342_v38, %v4084_v23  ;;  %v1353_v42 = vmul.f32 %v1342_v38, %v4102_v53  ;;  %v4456_v38 = vld [vmem:[%s4926_s10 + $0x68] sm:$0xff] }
 0x316   :  { %v1346_v44 = vrot.slane %v1335_v39, %v4952_v41  ;;  %v1362_v29 = vrot.slane %v1335_v39, %v4954_v31 }
 0x317   :  { %v1363_v45 = vadd.f32 %v1358_v0, %v1347_v51  ;;  %v1365_v48 = vadd.f32 %v1358_v0, %v1349_v19  ;;  %v1367_v49 = vadd.f32 %v1358_v0, %v1351_v34  ;;  %v1369_v50 = vadd.f32 %v1358_v0, %v1353_v42  ;;  %v4465_v51 = vld [vmem:[%s4926_s10 + $0xe0] sm:$0xff] }
 0x318   :  { %v1348_v22 = vmul.f32 %v1346_v44, %v4082_v21  ;;  %v1350_v27 = vmul.f32 %v1346_v44, %v4080_v20  ;;  %v1352_v23 = vmul.f32 %v1346_v44, %v4090_v37  ;;  %v1354_v53 = vmul.f32 %v1346_v44, %v4955_v47  ;;  %v4474_v44 = vld [vmem:[%s4926_s10 + $0x60] sm:$0xff]  ;;  %v4488_v47 = vld [vmem:[%s4926_s10 + $0xd8] sm:$0xff] }
 0x319   :  { %vm1371_vm4 = vcmp.ge.f32.partialorder %v1363_v45, 0.0  ;;  %vm1373_vm5 = vcmp.ge.f32.partialorder %v1365_v48, 0.0  ;;  %vm1375_vm6 = vcmp.ge.f32.partialorder %v1367_v49, 0.0  ;;  %vm1377_vm7 = vcmp.ge.f32.partialorder %v1369_v50, 0.0 }
 0x31a   :  { %v1380_v24 = vmul.f32 %v1379_v43, %v1363_v45  ;;  %v1382_v33 = vmul.f32 %v1379_v43, %v1365_v48  ;;  %v1384_v30 = vmul.f32 %v1379_v43, %v1367_v49  ;;  %v1386_v32 = vmul.f32 %v1379_v43, %v1369_v50 }
 0x31b   :  { %v1364_v52 = vadd.f32 %v1362_v29, %v1348_v22  ;;  %v1366_v54 = vadd.f32 %v1362_v29, %v1350_v27  ;;  %v1368_v55 = vadd.f32 %v1362_v29, %v1352_v23  ;;  %v1370_v56 = vadd.f32 %v1362_v29, %v1354_v53  ;;  %v3370_v27 = vld [vmem:[%s4928_s6 + $0x264] ss:$8 sps:$4 sm:$0xff]  }
 0x31c   :  { %v4406_v57 = vsel %vm1371_vm4, %v1363_v45, %v1380_v24  ;;  %v4408_v21 = vsel %vm1373_vm5, %v1365_v48, %v1382_v33  ;;  %v4410_v20 = vsel %vm1375_vm6, %v1367_v49, %v1384_v30  ;;  %v4412_v37 = vsel %vm1377_vm7, %v1369_v50, %v1386_v32  ;;  %v3365_v45 = vld [vmem:[%s4928_s6 + $0x270] ss:$8 sps:$4 sm:$0xff]   ;;  %v1411_v23 = vld [vmem:[#allocation2 + $0x40] sm:$0x80] }
 0x31d   :  { %1396 = vst [vmem:[#allocation2 + $0x10] sm:$0xff] %v4406_v57  ;;  %1398 = vst [vmem:[#allocation2 + $0x20] sm:$0xff] %v4408_v21  ;;  %vm1372_vm8 = vcmp.ge.f32.partialorder %v1364_v52, 0.0  ;;  %vm1374_vm9 = vcmp.ge.f32.partialorder %v1366_v54, 0.0  ;;  %vm1376_vm10 = vcmp.ge.f32.partialorder %v1368_v55, 0.0  ;;  %vm1378_vm11 = vcmp.ge.f32.partialorder %v1370_v56, 0.0 }
 0x31e   :  { %1400 = vst [vmem:[#allocation2 + $0x50] sm:$0xff] %v4410_v20  ;;  %1402 = vst [vmem:[#allocation2 + $0x60] sm:$0xff] %v4412_v37  ;;  %v1381_v58 = vmul.f32 %v1379_v43, %v1364_v52  ;;  %v1383_v59 = vmul.f32 %v1379_v43, %v1366_v54  ;;  %v1385_v60 = vmul.f32 %v1379_v43, %v1368_v55  ;;  %v1430_v16 = vrot.slane %v4406_v57, 7  ;;  %v1992_v33 = vld [vmem:[#allocation2 + $0x38] sm:$0x1] }
 0x31f   :  { %v1387_v61 = vmul.f32 %v1379_v43, %v1370_v56  ;;  %v1729_v4 = vpack.c.bf16 %v4408_v21, %v4406_v57  ;;  %v1731_v39 = vpack.c.bf16 %v4412_v37, %v4410_v20  ;;  %v4494_v30 = vld [vmem:[%s4926_s10 + $0x58] sm:$0xff] }
 0x320   :  { %v1389_v62 = vsel %vm1372_vm8, %v1364_v52, %v1381_v58  ;;  %v4418_v63 = vsel %vm1374_vm9, %v1366_v54, %v1383_v59  ;;  %v1393_v1 = vsel %vm1376_vm10, %v1368_v55, %v1385_v60  ;;  %v1431_v48 = vsel %vm128_vm1, %v1429_v18, %v1430_v16  ;;  %v4500_v52 = vld [vmem:[%s4926_s10 + $0xd0] sm:$0xff]  ;;  %v3368_v54 = vld [vmem:[%s4928_s6 + $0x260] ss:$8 sps:$4 sm:$0xff]  }
 0x321   :  { %v4420_v2 = vsel %vm1378_vm11, %v1370_v56, %v1387_v61  ;;  %1397 = vst [vmem:[#allocation2 + $0x18] sm:$0xff] %v1389_v62  ;;  %1399 = vst [vmem:[#allocation2 + $0x28] sm:$0xff] %v4418_v63  ;;  %v1730_v3 = vpack.c.bf16 %v4418_v63, %v1389_v62  ;;  %v1433_v13 = vrot.slane %v1389_v62, 7  ;;  %v1443_v40 = vrot.slane %v1393_v1, 7  ;;  %v3373_v57 = vld [vmem:[%s4928_s6 + $0x254] ss:$8 sps:$4 sm:$0xff]  }
 0x322   :  { %1401 = vst [vmem:[#allocation2 + $0x58] sm:$0xff] %v1393_v1  ;;  %1403 = vst [vmem:[#allocation2 + $0x68] sm:$0xff] %v4420_v2  ;;  %v1732_v5 = vpack.c.bf16 %v4420_v2, %v1393_v1  ;;  %v1440_v55 = vrot.slane %v4410_v20, 7  ;;  %v1439_v56 = vrot.slane %v1411_v23, 7  ;;  %v2015_v58 = vrot.slane %v4418_v63, 1  ;;  %v4514_v60 = vld [vmem:[%s4926_s10 + $0x50] sm:$0xff] }
 0x323   :  { %1958 = vmatprep.mubr.bf16.mxu1 %v1730_v3  ;;  %v1434_v19 = vsel %vm128_vm1, %v1432_v14, %v1433_v13  ;;  %v1444_v22 = vsel %vm128_vm1, %v1442_v26, %v1443_v40  ;;  %v2019_v59 = vrot.slane %v1992_v33, 1  ;;  %v4521_v20 = vld [vmem:[%s4926_s10 + $0xc8] sm:$0xff]  ;;  %v3371_v1 = vld [vmem:[%s4928_s6 + $0x250] ss:$8 sps:$4 sm:$0xff]  }
 0x324   :  { %1959 = vmatmul.mubr.bf16.vlgmr.msra.gmra.mxu1 %v1729_v4  ;;  %v1409_v7 = vld [vmem:[#allocation2 + $0x20] sm:$0x7f]  ;;  %v4528_v63 = vld [vmem:[%s4926_s10 + $0x48] sm:$0xff]  ;;  %v1441_v3 = vsel %vm128_vm1, %v1439_v56, %v1440_v55  ;;  %v4578_v18 = vld [vmem:[%s4926_s10 + $0x30] sm:$0xff] }
 0x325   :  { %1968 = vmatprep.mubr.bf16.mxu1 %v1732_v5  ;;  %3056 = vmatpush3.msra.mxu1 %v4431_v9  ;;  %v1435_v10 = vrot.slane %v1409_v7, 7  ;;  %v1415_v43 = vld [vmem:[#allocation2 + $0x60] sm:$0x7f]  ;;  %v2020_v6 = vsel %vm711_vm2, %v2015_v58, %v2019_v59  ;;  %v3401_v59 = vld [vmem:[%s4928_s6 + $0x2b0] ss:$8 sps:$4 sm:$0xff]  }
 0x326   :  { %3057 = vmatprep.subr.mxu1 %v4437_v12  ;;  %v1445_v24 = vrot.slane %v1415_v43, 7  ;;  %v4538_v4 = vld [vmem:[%s4926_s10 + $0xc0] sm:$0xff]  ;;  %v4632_v43 = vld [vmem:[%s4926_s10 + $0x90] sm:$0xff] }
 0x327   :  { %3058 = vmatpush3.msra.mxu1 %v4443_v15  ;;  %v1436_v0 = vsel %vm128_vm1, %v1430_v16, %v1435_v10  ;;  %v3376_v7 = vld [vmem:[%s4928_s6 + $0x244] ss:$8 sps:$4 sm:$0xff]   ;;  %v3374_v14 = vld [vmem:[%s4928_s6 + $0x240] ss:$8 sps:$4 sm:$0xff]   ;;  %v3379_v16 = vld [vmem:[%s4928_s6 + $0x234] ss:$8 sps:$4 sm:$0xff]  }
 0x328   :  { %v1410_v17 = vld [vmem:[#allocation2 + $0x28] sm:$0x7f]  ;;  %3059 = vmatprep.subr.mxu1 %v4450_v25  ;;  %v1988_v49 = vld [vmem:[#allocation2 + $0x18] sm:$0xfe]  ;;  %v1457_v50 = vpack.c.bf16 %v1436_v0, %v1431_v48  ;;  %v1446_v61 = vsel %vm128_vm1, %v1440_v55, %v1445_v24  ;;  %v4608_v0 = vld [vmem:[%s4926_s10 + $0x20] sm:$0xff] }
 0x329   :  { %v1416_v46 = vld [vmem:[#allocation2 + $0x68] sm:$0x7f]  ;;  %v1437_v28 = vrot.slane %v1410_v17, 7  ;;  %3060 = vmatpush3.msra.mxu1 %v4456_v38  ;;  %v2014_v32 = vrot.slane %v1988_v49, 1  ;;  %v1459_v5 = vpack.c.bf16 %v1446_v61, %v1441_v3  ;;  %v4572_v17 = vld [vmem:[%s4926_s10 + $0xb0] sm:$0xff] }
 0x32a   :  { %v1447_v35 = vrot.slane %v1416_v46, 7  ;;  %3061 = vmatprep.subr.mxu1 %v4465_v51  ;;  %v4584_v46 = vld [vmem:[%s4926_s10 + $0xa8] sm:$0xff]  ;;  %v3383_v48 = vld [vmem:[%s4928_s6 + $0x210] ss:$8 sps:$4 sm:$0xff]  }
 0x32b   :  { %v1438_v34 = vsel %vm128_vm1, %v1433_v13, %v1437_v28  ;;  %3062 = vmatpush3.msra.mxu1 %v4474_v44  ;;  %v2016_v62 = vsel %vm711_vm2, %v2014_v32, %v2015_v58  ;;  %v4560_v13 = vld [vmem:[%s4926_s10 + $0x38] sm:$0xff]  ;;  %v4593_v28 = vld [vmem:[%s4926_s10 + $0x28] sm:$0xff]  ;;  %v1987_v3 = vld [vmem:[#allocation2 + $0x10] sm:$0xfe] }
 0x32c   :  { %v1448_v42 = vsel %vm128_vm1, %v1443_v40, %v1447_v35  ;;  %v1458_v29 = vpack.c.bf16 %v1438_v34, %v1434_v19  ;;  %1969 = vmatmul.mubr.bf16.gmra.mxu1 %v1731_v39  ;;  %3063 = vmatprep.subr.mxu1 %v4488_v47  ;;  %v2040_v10 = vpack.c.bf16 %v2020_v6, %v2016_v62  ;;  %v3377_v40 = vld [vmem:[%s4928_s6 + $0x230] ss:$8 sps:$4 sm:$0xff]   ;;  %v3382_v26 = vld [vmem:[%s4928_s6 + $0x224] ss:$8 sps:$4 sm:$0xff]   ;;  %v3380_v19 = vld [vmem:[%s4928_s6 + $0x220] ss:$8 sps:$4 sm:$0xff]  }
 0x32d   :  { %v1460_v53 = vpack.c.bf16 %v1448_v42, %v1444_v22  ;;  %3064 = vmatpush3.msra.mxu1 %v4494_v30  ;;  %v4602_v35 = vld [vmem:[%s4926_s10 + $0xa0] sm:$0xff]  ;;  %v4614_v39 = vld [vmem:[%s4926_s10 + $0x98] sm:$0xff]  ;;  %v4653_v49 = vld [vmem:[%s4926_s10 + $0x8] sm:$0xff] }
 0x32e   :  { %1685 = vmatprep.mubr.bf16.mxu0 %v1458_v29  ;;  %3065 = vmatprep.subr.mxu1 %v4500_v52  ;;  %v4623_v34 = vld [vmem:[%s4926_s10 + $0x18] sm:$0xff]  ;;  %v4638_v29 = vld [vmem:[%s4926_s10 + $0x10] sm:$0xff]  ;;  %v4662_v22 = vld [vmem:[%s4926_s10 + $0x80] sm:$0xff] }
 0x32f   :  { %1686 = vmatmul.mubr.bf16.vlgmr.msra.gmra.mxu0 %v1457_v50  ;;  %3066 = vmatpush3.msra.mxu1 %v4514_v60  ;;  %v3385_v42 = vld [vmem:[%s4928_s6 + $0x214] ss:$8 sps:$4 sm:$0xff]   ;;  %v3388_v50 = vld [vmem:[%s4928_s6 + $0x204] ss:$8 sps:$4 sm:$0xff]   ;;  %v3386_v23 = vld [vmem:[%s4928_s6 + $0x200] ss:$8 sps:$4 sm:$0xff]  }
 0x330   :  { %2237 = vmatpush1.bf16.msra.mxu0 %v3365_v45  ;;  %1695 = vmatprep.mubr.bf16.mxu0 %v1460_v53  ;;  %v4644_v45 = vld [vmem:[%s4926_s10 + $0x88] sm:$0xff]  ;;  %v3391_v53 = vld [vmem:[%s4928_s6 + $0x2f4] ss:$8 sps:$4 sm:$0xff]   ;;  %v3389_v24 = vld [vmem:[%s4928_s6 + $0x2f0] ss:$8 sps:$4 sm:$0xff]  }
 0x331   :  { %2238 = vmatprep.subr.bf16.mxu0 %v3370_v27  ;;  %3067 = vmatprep.subr.mxu1 %v4521_v20  ;;  %v4668_v27 = vld [vmem:[%s4926_s10] sm:$0xff]  ;;  %v3395_v55 = vld [vmem:[%s4928_s6 + $0x2d0] ss:$8 sps:$4 sm:$0xff]   ;;  %v3403_v58 = vld [vmem:[%s4928_s6 + $0x2b4] ss:$8 sps:$4 sm:$0xff]  }
 0x332   :  { %3068 = vmatpush3.msra.mxu1 %v4528_v63  ;;  %v3394_v33 = vld [vmem:[%s4928_s6 + $0x2e4] ss:$8 sps:$4 sm:$0xff]   ;;  %v3392_v32 = vld [vmem:[%s4928_s6 + $0x2e0] ss:$8 sps:$4 sm:$0xff]   ;;  %v1994_v6 = vld [vmem:[#allocation2 + $0x58] sm:$0xfe] }
 0x333   :  { %3069 = vmatprep.subr.mxu1 %v4538_v4  ;;  %v3400_v56 = vld [vmem:[%s4928_s6 + $0x2c4] ss:$8 sps:$4 sm:$0xff]   ;;  %v3404_v62 = vld [vmem:[%s4928_s6 + $0x2a0] ss:$8 sps:$4 sm:$0xff]  }
 0x334   :  { %2239 = vmatpush1.bf16.msra.mxu0 %v3368_v54  ;;  %3070 = vmatpush3.msra.mxu1 %v4548_v8  ;;  %v3397_v54 = vld [vmem:[%s4928_s6 + $0x2d4] ss:$8 sps:$4 sm:$0xff]   ;;  %v3406_v61 = vld [vmem:[%s4928_s6 + $0x2a4] ss:$8 sps:$4 sm:$0xff]  }
 0x335   :  { %2240 = vmatprep.subr.bf16.mxu0 %v3373_v57  ;;  %3071 = vmatprep.subr.mxu1 %v4554_v11  ;;  %v3398_v57 = vld [vmem:[%s4928_s6 + $0x2c0] ss:$8 sps:$4 sm:$0xff]  }
 0x336   :  { %3072 = vmatpush3.msra.mxu1 %v4560_v13 }
 0x337   :  { %1696 = vmatmul.mubr.bf16.gmra.mxu0 %v1459_v5  ;;  %3073 = vmatprep.subr.mxu1 %v4572_v17  ;;  %v3407_v5 = vld [vmem:[%s4928_s6 + $0x290] ss:$8 sps:$4 sm:$0xff]  }
 0x338   :  { %2241 = vmatpush1.bf16.msra.mxu0 %v3371_v1  ;;  %2268 = vmatprep.mubr.bf16.mxu0 %v2040_v10  ;;  %v3409_v1 = vld [vmem:[%s4928_s6 + $0x294] ss:$8 sps:$4 sm:$0xff]   ;;  %v1991_v10 = vld [vmem:[#allocation2 + $0x30] sm:$0x1] }
 0x339   :  { %2242 = vmatprep.subr.bf16.mxu0 %v3376_v7  ;;  %3074 = vmatpush3.msra.mxu1 %v4578_v18  ;;  %v3412_v7 = vld [vmem:[%s4928_s6 + $0x284] ss:$8 sps:$4 sm:$0xff]  }
 0x33a   :  { %3075 = vmatprep.subr.mxu1 %v4584_v46 }
 0x33b   :  { %3076 = vmatpush3.msra.mxu1 %v4593_v28 }
 0x33c   :  { %2243 = vmatpush1.bf16.msra.mxu0 %v3374_v14  ;;  %3077 = vmatprep.subr.mxu1 %v4602_v35  ;;  %v2011_v14 = vrot.slane %v1987_v3, 1 }
 0x33d   :  { %2244 = vmatprep.subr.bf16.mxu0 %v3379_v16  ;;  %3078 = vmatpush3.msra.mxu1 %v4608_v0  ;;  %v1998_v16 = vld [vmem:[#allocation2 + $0x78] sm:$0x1] }
 0x33e   :  { %3079 = vmatprep.subr.mxu1 %v4614_v39 }
 0x33f   :  { %3080 = vmatpush3.msra.mxu1 %v4623_v34 }
 0x340   :  { %2245 = vmatpush1.bf16.msra.mxu0 %v3377_v40  ;;  %3081 = vmatprep.subr.mxu1 %v4632_v43  ;;  %v2024_v40 = vrot.slane %v1994_v6, 1 }
 0x341   :  { %2246 = vmatprep.subr.bf16.mxu0 %v3382_v26  ;;  %3082 = vmatpush3.msra.mxu1 %v4638_v29  ;;  %v3410_v26 = vld [vmem:[%s4928_s6 + $0x280] ss:$8 sps:$4 sm:$0xff]  }
 0x342   :  { %3083 = vmatprep.subr.mxu1 %v4644_v45 }
 0x343   :  { %3084 = vmatpush3.msra.mxu1 %v4653_v49 }
 0x344   :  { %2247 = vmatpush1.bf16.msra.mxu0 %v3380_v19  ;;  %3085 = vmatprep.subr.mxu1 %v4662_v22  ;;  %v2012_v19 = vrot.slane %v4408_v21, 1  ;;  %v3448_v21 = vld [vmem:[%s4926_s10 + $0xf8] sm:$0xff] }
 0x345   :  { %2248 = vmatprep.subr.bf16.mxu0 %v3385_v42  ;;  %3086 = vmatpush3.msra.mxu1 %v4668_v27  ;;  %v2017_v42 = vrot.slane %v1991_v10, 1 }
 0x348   :  { %2249 = vmatpush1.bf16.msra.mxu0 %v3383_v48  ;;  %v2025_v48 = vrot.slane %v4420_v2, 1 }
 0x349   :  { %2250 = vmatprep.subr.bf16.mxu0 %v3388_v50  ;;  %v2029_v50 = vrot.slane %v1998_v16, 1 }
 0x34c   :  { %2251 = vmatpush1.bf16.msra.mxu0 %v3386_v23  ;;  %v2013_v23 = vsel %vm711_vm2, %v2011_v14, %v2012_v19 }
 0x34d   :  { %2252 = vmatprep.subr.bf16.mxu0 %v3391_v53  ;;  %v2026_v53 = vsel %vm711_vm2, %v2024_v40, %v2025_v48 }
 0x350   :  { %2253 = vmatpush2.bf16.msra.mxu0 %v3389_v24  ;;  %v1993_v24 = vld [vmem:[#allocation2 + $0x50] sm:$0xfe] }
 0x351   :  { %2254 = vmatprep.subr.bf16.mxu0 %v3394_v33  ;;  %v2018_v33 = vsel %vm711_vm2, %v2012_v19, %v2017_v42 }
 0x354   :  { %2255 = vmatpush2.bf16.msra.mxu0 %v3392_v32  ;;  %v2039_v32 = vpack.c.bf16 %v2018_v33, %v2013_v23 }
 0x355   :  { %2256 = vmatprep.subr.bf16.mxu0 %v3397_v54  ;;  %v2030_v54 = vsel %vm711_vm2, %v2025_v48, %v2029_v50 }
 0x356   :  { %v2042_v2 = vpack.c.bf16 %v2030_v54, %v2026_v53 }
 0x358   :  { %2257 = vmatpush2.bf16.msra.mxu0 %v3395_v55  ;;  %v1997_v55 = vld [vmem:[#allocation2 + $0x70] sm:$0x1] }
 0x359   :  { %2258 = vmatprep.subr.bf16.mxu0 %v3400_v56  ;;  %v2021_v56 = vrot.slane %v1993_v24, 1 }
 0x35c   :  { %2259 = vmatpush2.bf16.msra.mxu0 %v3398_v57  ;;  %v2022_v57 = vrot.slane %v4412_v37, 1 }
 0x35d   :  { %2260 = vmatprep.subr.bf16.mxu0 %v3403_v58  ;;  %v2027_v58 = vrot.slane %v1997_v55, 1 }
 0x360   :  { %2261 = vmatpush2.bf16.msra.mxu0 %v3401_v59  ;;  %v2023_v59 = vsel %vm711_vm2, %v2021_v56, %v2022_v57 }
 0x361   :  { %2262 = vmatprep.subr.bf16.mxu0 %v3406_v61  ;;  %v2028_v61 = vsel %vm711_vm2, %v2022_v57, %v2027_v58 }
 0x364   :  { %2263 = vmatpush2.bf16.msra.mxu0 %v3404_v62  ;;  %v2041_v62 = vpack.c.bf16 %v2028_v61, %v2023_v59 }
 0x365   :  { %2264 = vmatprep.subr.bf16.mxu0 %v3409_v1 }
 0x368   :  { %2265 = vmatpush2.bf16.msra.mxu0 %v3407_v5 }
 0x369   :  { %2266 = vmatprep.subr.bf16.mxu0 %v3412_v7 }
 0x36c   :  { %2267 = vmatpush2.bf16.msra.mxu0 %v3410_v26 }
 0x36d   :  { %3090 = vmatprep.subr.msk.mxu0 %vm1167_vm3, %v3448_v21 }
 0x36f   :  { %2269 = vmatmul.mubr.bf16.vlgmr.msra.gmra.mxu0 %v2039_v32 }
 0x370   :  { %2278 = vmatprep.mubr.bf16.mxu0 %v2042_v2  ;;  %3091 = vmatpush3.xpose.msk.msra.mxu0 %vm1167_vm3, %v4431_v9 }
 0x371   :  { %3092 = vmatprep.subr.msk.mxu0 %vm1167_vm3, %v4437_v12 }
 0x374   :  { %3093 = vmatpush3.xpose.msk.msra.mxu0 %vm1167_vm3, %v4443_v15 }
 0x375   :  { %3094 = vmatprep.subr.msk.mxu0 %vm1167_vm3, %v4450_v25 }
 0x377   :  { %2279 = vmatmul.mubr.bf16.gmra.mxu0 %v2041_v62 }
 0x378   :  { %3095 = vmatpush3.xpose.msk.msra.mxu0 %vm1167_vm3, %v4456_v38 }
 0x379   :  { %3096 = vmatprep.subr.msk.mxu0 %vm1167_vm3, %v4465_v51 }
 0x37c   :  { %3097 = vmatpush3.xpose.msk.msra.mxu0 %vm1167_vm3, %v4474_v44  ;;  %v1404_v44 = vld [vmem:[%s4932_s7] sm:$0x3] }
 0x37d   :  { %3098 = vmatprep.subr.msk.mxu0 %vm1167_vm3, %v4488_v47 }
 0x380   :  { %3099 = vmatpush3.xpose.msk.msra.mxu0 %vm1167_vm3, %v4494_v30  ;;  %v1710_v30 = vrot.slane %v1404_v44, %v4952_v41 }
 0x381   :  { %3100 = vmatprep.subr.msk.mxu0 %vm1167_vm3, %v4500_v52 }
 0x384   :  { %3101 = vmatpush3.xpose.msk.msra.mxu0 %vm1167_vm3, %v4514_v60  ;;  %v1714_v60 = vrot.slane %v1404_v44, %v4954_v31 }
 0x385   :  { %3102 = vmatprep.subr.msk.mxu0 %vm1167_vm3, %v4521_v20 }
 0x388   :  { %3103 = vmatpush3.xpose.msk.msra.mxu0 %vm1167_vm3, %v4528_v63 }
 0x389   :  { %3104 = vmatprep.subr.msk.mxu0 %vm1167_vm3, %v4538_v4 }
 0x38c   :  { %3105 = vmatpush3.xpose.msk.msra.mxu0 %vm1167_vm3, %v4548_v8 }
 0x38d   :  { %3106 = vmatprep.subr.msk.mxu0 %vm1167_vm3, %v4554_v11 }
 0x390   :  { %3107 = vmatpush3.xpose.msk.msra.mxu0 %vm1167_vm3, %v4560_v13 }
 0x391   :  { %3108 = vmatprep.subr.msk.mxu0 %vm1167_vm3, %v4572_v17 }
 0x394   :  { %3109 = vmatpush3.xpose.msk.msra.mxu0 %vm1167_vm3, %v4578_v18 }
 0x395   :  { %3110 = vmatprep.subr.msk.mxu0 %vm1167_vm3, %v4584_v46 }
 0x398   :  { %3111 = vmatpush3.xpose.msk.msra.mxu0 %vm1167_vm3, %v4593_v28 }
 0x399   :  { %3112 = vmatprep.subr.msk.mxu0 %vm1167_vm3, %v4602_v35 }
 0x39c   :  { %3113 = vmatpush3.xpose.msk.msra.mxu0 %vm1167_vm3, %v4608_v0 }
 0x39d   :  { %3114 = vmatprep.subr.msk.mxu0 %vm1167_vm3, %v4614_v39 }
 0x3a0   :  { %3115 = vmatpush3.xpose.msk.msra.mxu0 %vm1167_vm3, %v4623_v34 }
 0x3a1   :  { %3116 = vmatprep.subr.msk.mxu0 %vm1167_vm3, %v4632_v43 }
 0x3a4   :  { %3117 = vmatpush3.xpose.msk.msra.mxu0 %vm1167_vm3, %v4638_v29 }
 0x3a5   :  { %3118 = vmatprep.subr.msk.mxu0 %vm1167_vm3, %v4644_v45 }
 0x3a8   :  { %3119 = vmatpush3.xpose.msk.msra.mxu0 %vm1167_vm3, %v4653_v49 }
 0x3a9   :  { %3120 = vmatprep.subr.msk.mxu0 %vm1167_vm3, %v4662_v22 }
 0x3ac   :  { %3121 = vmatpush3.xpose.msk.msra.mxu0 %vm1167_vm3, %v4668_v27 }
 0x3e4   :  { %v1960_v25 = vpop.f32.mrf.mxu1 }
 0x3e6   :  { %v1962_v51 = vpop.f32.mrf.mxu1 }
 0x3e8   :  { %v1964_v52 = vpop.f32.mrf.mxu1 }
 0x3ea   :  { %v1966_v4 = vpop.f32.mrf.mxu1 }
 0x3ec   :  { %v1970_v17 = vpop.f32.mrf.mxu1 }
 0x3ee   :  { %v1972_v34 = vpop.f32.mrf.mxu1 }
 0x3ef   :  { %v1687_v37 = vpop.f32.mrf.mxu0 }
 0x3f0   :  { %v1717_v63 = vadd.f32 %v1710_v30, %v1687_v37  ;;  %v1974_v6 = vpop.f32.mrf.mxu1 }
 0x3f1   :  { %v1689_v9 = vpop.f32.mrf.mxu0 }
 0x3f2   :  { %v1718_v8 = vadd.f32 %v1714_v60, %v1689_v9  ;;  %v1979_v18 = vadd.f32 %v1960_v25, %v1717_v63  ;;  %v1976_v23 = vpop.f32.mrf.mxu1 }
 0x3f3   :  { %v1691_v12 = vpop.f32.mrf.mxu0 }
 0x3f4   :  { %v1719_v13 = vadd.f32 %v1710_v30, %v1691_v12  ;;  %v1980_v0 = vadd.f32 %v1962_v51, %v1718_v8 }
 0x3f5   :  { %v1693_v15 = vpop.f32.mrf.mxu0 }
 0x3f6   :  { %v1720_v28 = vadd.f32 %v1714_v60, %v1693_v15  ;;  %v1981_v45 = vadd.f32 %v1964_v52, %v1719_v13 }
 0x3f7   :  { %v1697_v38 = vpop.f32.mrf.mxu0 }
 0x3f8   :  { %v1721_v43 = vadd.f32 %v1710_v30, %v1697_v38  ;;  %v1982_v1 = vadd.f32 %v1966_v4, %v1720_v28 }
 0x3f9   :  { %v1699_v47 = vpop.f32.mrf.mxu0 }
 0x3fa   :  { %v1722_v22 = vadd.f32 %v1714_v60, %v1699_v47  ;;  %v1983_v10 = vadd.f32 %v1970_v17, %v1721_v43 }
 0x3fb   :  { %v1701_v20 = vpop.f32.mrf.mxu0 }
 0x3fc   :  { %v1723_v3 = vadd.f32 %v1710_v30, %v1701_v20  ;;  %v1984_v26 = vadd.f32 %v1972_v34, %v1722_v22 }
 0x3fd   :  { %v1703_v11 = vpop.f32.mrf.mxu0 }
 0x3fe   :  { %v1724_v14 = vadd.f32 %v1714_v60, %v1703_v11  ;;  %v1985_v48 = vadd.f32 %v1974_v6, %v1723_v3 }
 0x400   :  { %v1986_v55 = vadd.f32 %v1976_v23, %v1724_v14 }
 0x42f   :  { %v2270_v46 = vpop.f32.mrf.mxu0 }
 0x430   :  { %v4802_v35 = vadd.f32 %v2270_v46, %v1979_v18 }
 0x431   :  { %v2272_v39 = vpop.f32.mrf.mxu0 }
 0x432   :  { %2297 = vst [vmem:[#allocation2 + $0x10] sm:$0xff] %v4802_v35  ;;  %v4805_v29 = vadd.f32 %v2272_v39, %v1980_v0  ;;  %v2331_v33 = vmul.f32 %v4802_v35, %v4802_v35 }
 0x433   :  { %v2274_v49 = vpop.f32.mrf.mxu0 }
 0x434   :  { %2298 = vst [vmem:[#allocation2 + $0x18] sm:$0xff] %v4805_v29  ;;  %v4808_v27 = vadd.f32 %v2274_v49, %v1981_v45  ;;  %v2332_v2 = vmul.f32 %v4805_v29, %v4805_v29 }
 0x435   :  { %v2276_v5 = vpop.f32.mrf.mxu0 }
 0x436   :  { %2299 = vst [vmem:[#allocation2 + $0x20] sm:$0xff] %v4808_v27  ;;  %v4811_v7 = vadd.f32 %v2276_v5, %v1982_v1  ;;  %v2333_v19 = vmul.f32 %v4808_v27, %v4808_v27  ;;  %v2313_v24 = vadd.f32 %v4808_v27, %v4802_v35 }
 0x437   :  { %v2280_v16 = vpop.f32.mrf.mxu0 }
 0x438   :  { %2300 = vst [vmem:[#allocation2 + $0x28] sm:$0xff] %v4811_v7  ;;  %v4814_v40 = vadd.f32 %v2280_v16, %v1983_v10  ;;  %v2334_v50 = vmul.f32 %v4811_v7, %v4811_v7  ;;  %v2322_v21 = vadd.f32 %v4811_v7, %v4805_v29  ;;  %v2339_v59 = vadd.f32 %v2333_v19, %v2331_v33 }
 0x439   :  { %v2282_v42 = vpop.f32.mrf.mxu0 }
 0x43a   :  { %2301 = vst [vmem:[#allocation2 + $0x50] sm:$0xff] %v4814_v40  ;;  %v4821_v53 = vadd.f32 %v2282_v42, %v1984_v26  ;;  %v2335_v32 = vmul.f32 %v4814_v40, %v4814_v40  ;;  %v2314_v58 = vadd.f32 %v2313_v24, %v4814_v40  ;;  %v2348_v37 = vadd.f32 %v2334_v50, %v2332_v2 }
 0x43b   :  { %v2284_v54 = vpop.f32.mrf.mxu0 }
 0x43c   :  { %2302 = vst [vmem:[#allocation2 + $0x58] sm:$0xff] %v4821_v53  ;;  %v4834_v56 = vadd.f32 %v2284_v54, %v1985_v48  ;;  %v2336_v57 = vmul.f32 %v4821_v53, %v4821_v53  ;;  %v2323_v62 = vadd.f32 %v2322_v21, %v4821_v53  ;;  %v2340_v25 = vadd.f32 %v2339_v59, %v2335_v32  ;;  %v2435_v21 = vld [vmem:[%s4933_s8] sm:$0x1] }
 0x43d   :  { %v2286_v61 = vpop.f32.mrf.mxu0 }
 0x43e   :  { %2303 = vst [vmem:[#allocation2 + $0x60] sm:$0xff] %v4834_v56  ;;  %v4841_v9 = vadd.f32 %v2286_v61, %v1986_v55  ;;  %v2315_v12 = vadd.f32 %v2314_v58, %v4834_v56  ;;  %v2337_v15 = vmul.f32 %v4834_v56, %v4834_v56  ;;  %v2349_v38 = vadd.f32 %v2348_v37, %v2336_v57  ;;  %v2456_v58 = vld [vmem:[%s4934_s9] sm:$0x1] }
 0x440   :  { %2304 = vst [vmem:[#allocation2 + $0x68] sm:$0xff] %v4841_v9  ;;  %v2324_v51 = vadd.f32 %v2323_v62, %v4841_v9  ;;  %v2338_v44 = vmul.f32 %v4841_v9, %v4841_v9  ;;  %v2316_v47 = vrot.slane %v2315_v12, 4  ;;  %v2341_v30 = vadd.f32 %v2340_v25, %v2337_v15 }
 0x442   :  { %v2325_v52 = vrot.slane %v2324_v51, 4  ;;  %v2350_v60 = vadd.f32 %v2349_v38, %v2338_v44  ;;  %v2317_v20 = vadd.f32 %v2316_v47, %v2315_v12  ;;  %v2342_v63 = vrot.slane %v2341_v30, 4 }
 0x444   :  { %v2326_v4 = vadd.f32 %v2325_v52, %v2324_v51  ;;  %v2351_v8 = vrot.slane %v2350_v60, 4  ;;  %v2318_v11 = vrot.slane %v2317_v20, 2  ;;  %v2343_v13 = vadd.f32 %v2342_v63, %v2341_v30  ;;  %v2572_v30 = vld [vmem:[%s4925_s0] sm:$0xff]  ;;  %v2574_v52 = vld [vmem:[%s4925_s0 + $0x10] sm:$0xff] }
 0x446   :  { %v2327_v17 = vrot.slane %v2326_v4, 2  ;;  %v2352_v18 = vadd.f32 %v2351_v8, %v2350_v60  ;;  %v2344_v46 = vrot.slane %v2343_v13, 2  ;;  %v2319_v28 = vadd.f32 %v2318_v11, %v2317_v20  ;;  %v2576_v60 = vld [vmem:[%s4925_s0 + $0x20] sm:$0xff] }
 0x448   :  { %v2328_v0 = vadd.f32 %v2327_v17, %v2326_v4  ;;  %v2353_v39 = vrot.slane %v2352_v18, 2  ;;  %v2345_v34 = vadd.f32 %v2344_v46, %v2343_v13  ;;  %v2320_v22 = vrot.slane %v2319_v28, 1 }
 0x44a   :  { %v2329_v43 = vrot.slane %v2328_v0, 1  ;;  %v2354_v45 = vadd.f32 %v2353_v39, %v2352_v18  ;;  %v2346_v49 = vrot.slane %v2345_v34, 1  ;;  %v2321_v10 = vadd.f32 %v2320_v22, %v2319_v28  ;;  %v2573_v18 = vld [vmem:[%s4925_s0 + $0x8] sm:$0xff] }
 0x44c   :  { %v2355_v1 = vrot.slane %v2354_v45, 1  ;;  %v2347_v3 = vadd.f32 %v2346_v49, %v2345_v34  ;;  %v2330_v5 = vadd.f32 %v2329_v43, %v2328_v0  ;;  %v2575_v0 = vld [vmem:[%s4925_s0 + $0x18] sm:$0xff] }
 0x44e   :  { %v2356_v6 = vadd.f32 %v2355_v1, %v2354_v45  ;;  %v2357_v16 = vsel %vm128_vm1, %v2321_v10, %v2347_v3 }
 0x450   :  { %v2358_v14 = vsel %vm128_vm1, %v2330_v5, %v2356_v6 }
 0x451   :  { %2423 = vmatprep.mubr.f32.mxu1 %v2358_v14 }
 0x452   :  { %2424 = vmatmul.mubr.f32.vlgmr.msra.gmra.mxu1 %v2357_v16 }
 0x512   :  { %v3087_v26 = vpop.f32.mrf.mxu1 }
 0x514   :  { %v3088_v19 = vpop.f32.mrf.mxu1 }
 0x515   :  { %v3089_v42 = vadd.f32 %v3088_v19, %v3087_v26 }
 0x517   :  { %v2429_v48 = vmul.f32 0.001953125, %v3089_v42 }
 0x519   :  { %v2430_v50 = vmul.f32 %v2429_v48, %v2429_v48 }
 0x51b   :  { %v2432_v23 = vrot.slane %v2430_v50, 7 }
 0x51d   :  { %v2434_v24 = vsub.f32 %v2429_v48, %v2432_v23 }
 0x51f   :  { %v2436_v33 = vadd.f32 0.8, %v2434_v24 }
 0x521   :  { %3415 = vrsqrt.f32 %v2436_v33 }
 0x52e   :  { %v3416_v32 = vpop.eup %3415 }
 0x52f   :  { %v2445_v54 = vrot.slane %v3416_v32, %v4244_v36 }
 0x531   :  { %v2446_v55 = vcombine.high %v2445_v54, %v2445_v54 }
 0x533   :  { %v2453_v2 = vrot.slane %v2446_v55, %v4244_v36 }
 0x535   :  { %v2455_v57 = vmul.f32 %v2453_v2, %v2435_v21 }
 0x537   :  { %v2457_v59 = vmul.f32 %v2455_v57, %v2429_v48 }
 0x539   :  { %v2458_v61 = vsub.f32 %v2456_v58, %v2457_v59 }
 0x53b   :  { %v2463_v62 = vrot.slane %v2458_v61, %v4952_v41 }
 0x53d   :  { %v2465_v37 = vsel %vm128_vm1, %v2455_v57, %v2463_v62 }
 0x53e   :  { %3122 = vmatprep.mubr.msk.f32.mxu0 %vm1167_vm3, %v2465_v37 }
 0x53f   :  { %3123 = vmatmul.mubr.msk.f32.vlgmr.msra.gmra.mxu0 %vm1167_vm3, %v2465_v37 }
 0x5ff   :  { %v2535_v12 = vpop.f32.mrf.mxu0 }
 0x600   :  { %v2543_v15 = vrot.slane %v2535_v12, %v4952_v41  ;;  %v2559_v36 = vrot.slane %v2535_v12, %v4954_v31 }
 0x601   :  { %v2537_v25 = vpop.f32.mrf.mxu0 }
 0x602   :  { %v2548_v38 = vmul.f32 %v2543_v15, %v4802_v35  ;;  %v2550_v51 = vmul.f32 %v2543_v15, %v4808_v27  ;;  %v2552_v44 = vmul.f32 %v2543_v15, %v4814_v40  ;;  %v2554_v47 = vmul.f32 %v2543_v15, %v4834_v56  ;;  %v2578_v35 = vld [vmem:[%s4925_s0 + $0x30] sm:$0xff] }
 0x603   :  { %v2547_v27 = vrot.slane %v2537_v25, %v4952_v41  ;;  %v2563_v40 = vrot.slane %v2537_v25, %v4954_v31 }
 0x604   :  { %v2564_v56 = vadd.f32 %v2559_v36, %v2548_v38  ;;  %v2566_v20 = vadd.f32 %v2559_v36, %v2550_v51  ;;  %v2568_v63 = vadd.f32 %v2559_v36, %v2552_v44  ;;  %v2570_v4 = vadd.f32 %v2559_v36, %v2554_v47 }
 0x605   :  { %v2549_v8 = vmul.f32 %v2547_v27, %v4805_v29  ;;  %v2551_v11 = vmul.f32 %v2547_v27, %v4811_v7  ;;  %v2553_v13 = vmul.f32 %v2547_v27, %v4821_v53  ;;  %v2555_v17 = vmul.f32 %v2547_v27, %v4841_v9  ;;  %v2577_v29 = vld [vmem:[%s4925_s0 + $0x28] sm:$0xff]  ;;  %v2579_v7 = vld [vmem:[%s4925_s0 + $0x38] sm:$0xff] }
 0x606   :  { %v2580_v46 = vadd.f32 %v2572_v30, %v2564_v56  ;;  %v2582_v41 = vadd.f32 %v2574_v52, %v2566_v20  ;;  %v2584_v28 = vadd.f32 %v2576_v60, %v2568_v63  ;;  %v2586_v31 = vadd.f32 %v2578_v35, %v2570_v4 }
 0x607   :  { %v2565_v53 = vadd.f32 %v2563_v40, %v2549_v8  ;;  %v2567_v9 = vadd.f32 %v2563_v40, %v2551_v11  ;;  %v2569_v39 = vadd.f32 %v2563_v40, %v2553_v13  ;;  %v2571_v34 = vadd.f32 %v2563_v40, %v2555_v17 }
 0x608   :  { %2588 = vst [vmem:[%s4935_s11] sm:$0xff] %v2580_v46  ;;  %2590 = vst [vmem:[%s4935_s11 + $0x10] sm:$0xff] %v2582_v41 }
 0x609   :  { %2592 = vst [vmem:[%s4935_s11 + $0x20] sm:$0xff] %v2584_v28  ;;  %2594 = vst [vmem:[%s4935_s11 + $0x30] sm:$0xff] %v2586_v31  ;;  %v2581_v43 = vadd.f32 %v2573_v18, %v2565_v53  ;;  %v2583_v45 = vadd.f32 %v2575_v0, %v2567_v9  ;;  %v2585_v49 = vadd.f32 %v2577_v29, %v2569_v39 }
 0x60a   :  { %v2587_v22 = vadd.f32 %v2579_v7, %v2571_v34 }
 0x60b   :  { %2589 = vst [vmem:[%s4935_s11 + $0x8] sm:$0xff] %v2581_v43  ;;  %2591 = vst [vmem:[%s4935_s11 + $0x18] sm:$0xff] %v2583_v45 }
 0x60c   :  { %2593 = vst [vmem:[%s4935_s11 + $0x28] sm:$0xff] %v2585_v49  ;;  %2595 = vst [vmem:[%s4935_s11 + $0x38] sm:$0xff] %v2587_v22 }

</bundles_post_ra>
